<compile_context>
chip_gen: v6e
topology: v6e:2x2x1
jax: 0.10.0
libtpu: 0.0.40
codegen_flags: <defaults>
</compile_context>

<pallas_src>
import jax
import jax.numpy as jnp
from jax import lax
from jax.experimental import pallas as pl
from jax.experimental.pallas import tpu as pltpu


def _round_up_128(n):
    return ((n + 127) // 128) * 128


# ----------------------------------------------------------------------------
# Pallas kernel (one batch block per grid step; time-major internal layout)
# ----------------------------------------------------------------------------
def attention_lstm_kernel(
    enc_x_ref,    # (T_enc*Bb, I)  f32  time-major flattened encoder input block
    dec_x_ref,    # (T_dec*Bb, I)  f32  time-major flattened decoder input block
    w_ih_e_ref,   # (I, 4H)        f32  encoder input->gates  (pre-transposed)
    w_hh_e_ref,   # (H, 4H)        f32  encoder hidden->gates (pre-transposed)
    b_e_ref,      # (1, 4H)        f32  encoder bias (b_ih + b_hh)
    w_ih_d_ref,   # (I, 4H)        f32  decoder input->gates
    w_hh_d_ref,   # (H, 4H)        f32  decoder hidden->gates
    b_d_ref,      # (1, 4H)        f32  decoder bias
    resp_ref,     # (Bb, T_dec, RESP_PAD) f32  [dec_h ; attn_value ; 0-pad]
    attn_ref,     # (Bb, T_dec, ATTN_PAD) f32  [softmax attn weights ; 0-pad]
    enc_xg_ref,   # scratch VMEM (T_enc*Bb, 4H)  precomputed encoder x-gates
    dec_xg_ref,   # scratch VMEM (T_dec*Bb, 4H)  precomputed decoder x-gates
    enc_hs_ref,   # scratch VMEM (T_enc*Bb, H)   encoder hidden states (time-major)
    dec_hs_ref,   # scratch VMEM (T_dec*Bb, H)   decoder hidden states (time-major)
):
    Bb, T_dec, RESP_PAD = resp_ref.shape
    ATTN_PAD = attn_ref.shape[-1]
    H = enc_hs_ref.shape[-1]
    T_enc = enc_hs_ref.shape[0] // Bb

    # ---- hoisted input->gate projections: two big MXU matmuls ---------------
    enc_xg_ref[...] = (
        jnp.dot(enc_x_ref[...], w_ih_e_ref[...], preferred_element_type=jnp.float32)
        + b_e_ref[...]
    )
    dec_xg_ref[...] = (
        jnp.dot(dec_x_ref[...], w_ih_d_ref[...], preferred_element_type=jnp.float32)
        + b_d_ref[...]
    )

    def lstm_gates(xg, h, c, w_hh_ref):
        # Load W_hh from VMEM inside the step (cheap: 3 vld slots/cycle) rather
        # than pinning hundreds of vregs across both loops.
        gates = xg + jnp.dot(h, w_hh_ref[...], preferred_element_type=jnp.float32)
        if H % 128 == 0:
            # lane-aligned gate slices: only the needed transcendentals (4H total)
            i_g = jax.nn.sigmoid(gates[:, 0:H])
            f_g = jax.nn.sigmoid(gates[:, H:2 * H])
            g_g = jnp.tanh(gates[:, 2 * H:3 * H])
            o_g = jax.nn.sigmoid(gates[:, 3 * H:4 * H])
        else:
            # tiny H (not lane aligned): two full-width EUP passes, slice after
            sig = jax.nn.sigmoid(gates)
            th = jnp.tanh(gates)
            i_g = sig[:, 0:H]
            f_g = sig[:, H:2 * H]
            g_g = th[:, 2 * H:3 * H]
            o_g = sig[:, 3 * H:4 * H]
        c_new = f_g * c + i_g * g_g
        h_new = o_g * jnp.tanh(c_new)
        return h_new, c_new

    h0 = jnp.zeros((Bb, H), jnp.float32)
    c0 = jnp.zeros((Bb, H), jnp.float32)

    # ---- encoder recurrence (only h @ W_hh on the serial path) --------------
    def enc_body(t, carry):
        h, c = carry
        xg = enc_xg_ref[pl.ds(t * Bb, Bb), :]            # (Bb, 4H) contiguous
        h, c = lstm_gates(xg, h, c, w_hh_e_ref)
        enc_hs_ref[pl.ds(t * Bb, Bb), :] = h             # ONE store per step
        return (h, c)

    h_e, c_e = lax.fori_loop(0, T_enc, enc_body, (h0, c0),
                             unroll=min(8, T_enc))

    # ---- decoder recurrence (attention NOT on the serial path) --------------
    def dec_body(t, carry):
        h, c = carry
        xg = dec_xg_ref[pl.ds(t * Bb, Bb), :]            # (Bb, 4H) contiguous
        h, c = lstm_gates(xg, h, c, w_hh_d_ref)
        dec_hs_ref[pl.ds(t * Bb, Bb), :] = h             # ONE store per step
        return (h, c)

    lax.fori_loop(0, T_dec, dec_body, (h_e, c_e), unroll=min(8, T_dec))

    # ---- attention, hoisted out of the recurrence (per batch element) -------
    for j in range(Bb):                                  # static, small Bb
        if Bb == 1:
            enc_h = enc_hs_ref[...]                      # (T_enc, H)
            dec_h = dec_hs_ref[...]                      # (T_dec, H)
        else:
            # strided sublane read of batch element j from the time-major slab
            enc_h = enc_hs_ref[pl.ds(j, T_enc, stride=Bb), :]
            dec_h = dec_hs_ref[pl.ds(j, T_dec, stride=Bb), :]

        # scores[d, t] = <dec_h[d], enc_h[t]>
        scores = lax.dot_general(dec_h, enc_h, (((1,), (1,)), ((), ())),
                                 preferred_element_type=jnp.float32)  # (T_dec, T_enc)
        m = jnp.max(scores, axis=-1, keepdims=True)
        e = jnp.exp(scores - m)
        s = jnp.sum(e, axis=-1, keepdims=True)
        inv = pl.reciprocal(s, approx=True)              # EUP slot
        inv = inv * (2.0 - s * inv)                      # one Newton step -> f32 accurate
        w = e * inv                                      # (T_dec, T_enc) softmax
        attn_v = jnp.dot(w, enc_h, preferred_element_type=jnp.float32)  # (T_dec, H)

        # lane-dense whole-slab output stores
        if H % 128 == 0:
            # 128-aligned H: direct unmasked slice stores, no concat copies
            resp_ref[j, :, pl.ds(0, H)] = dec_h
            resp_ref[j, :, pl.ds(H, H)] = attn_v
            if RESP_PAD > 2 * H:
                resp_ref[j, :, pl.ds(2 * H, RESP_PAD - 2 * H)] = jnp.zeros(
                    (T_dec, RESP_PAD - 2 * H), jnp.float32)
        else:
            parts = [dec_h, attn_v]
            rpad = RESP_PAD - 2 * H
            if rpad:
                parts.append(jnp.zeros((T_dec, rpad), jnp.float32))
            resp_ref[j] = jnp.concatenate(parts, axis=-1)

        apad = ATTN_PAD - T_enc
        if apad:
            w = jnp.concatenate([w, jnp.zeros((T_dec, apad), jnp.float32)], axis=-1)
        attn_ref[j] = w


# ----------------------------------------------------------------------------
# Wrapper: parameter plumbing + pallas_call
# ----------------------------------------------------------------------------
def attention_lstm_forward(enc_input, dec_input, params, batch_block=None):
    """enc_input, dec_input: (batch, seq, input_size) — batch-first, like the
    PyTorch call site. Returns (responses, attn_weights) with
    responses: (dec_seq, batch, 2*hidden), attn_weights: (dec_seq, batch, enc_seq).

    batch_block: batch elements per grid step. Default = whole batch (best for
    1-TC v5e/v6e). On v7x pass batch_block = batch // 2 so the "parallel" grid
    axis spreads the two halves across both TensorCores.
    """
    B, T_enc, I = enc_input.shape
    T_dec = dec_input.shape[1]
    H = params["w_hh_e"].shape[0]                        # (H, 4H)
    H2 = 2 * H
    RESP_PAD = _round_up_128(H2)
    ATTN_PAD = _round_up_128(T_enc)

    Bb = B if batch_block is None else batch_block
    assert B % Bb == 0
    G = B // Bb

    def to_blocks(x, T):
        # (B, T, I) -> (G, T*Bb, I); within a block, row index = t*Bb + j and
        # global batch index = g*Bb + j. XLA-side layout plumbing only.
        x = jnp.transpose(x, (1, 0, 2)).astype(jnp.float32)          # (T, B, I)
        x = x.reshape(T, G, Bb, I)
        x = jnp.transpose(x, (1, 0, 2, 3)).reshape(G, T * Bb, I)
        return x

    enc_x = to_blocks(enc_input, T_enc)
    dec_x = to_blocks(dec_input, T_dec)

    args = (
        enc_x, dec_x,
        params["w_ih_e"], params["w_hh_e"], params["b_e"],
        params["w_ih_d"], params["w_hh_d"], params["b_d"],
    )

    in_specs = [
        pl.BlockSpec((None, T_enc * Bb, I), lambda g: (g, 0, 0)),
        pl.BlockSpec((None, T_dec * Bb, I), lambda g: (g, 0, 0)),
        pl.BlockSpec((I, 4 * H), lambda g: (0, 0)),
        pl.BlockSpec((H, 4 * H), lambda g: (0, 0)),
        pl.BlockSpec((1, 4 * H), lambda g: (0, 0)),
        pl.BlockSpec((I, 4 * H), lambda g: (0, 0)),
        pl.BlockSpec((H, 4 * H), lambda g: (0, 0)),
        pl.BlockSpec((1, 4 * H), lambda g: (0, 0)),
    ]
    out_specs = [
        pl.BlockSpec((Bb, T_dec, RESP_PAD), lambda g: (g, 0, 0)),
        pl.BlockSpec((Bb, T_dec, ATTN_PAD), lambda g: (g, 0, 0)),
    ]
    scratch_shapes = [
        pltpu.VMEM((T_enc * Bb, 4 * H), jnp.float32),    # encoder x-gates
        pltpu.VMEM((T_dec * Bb, 4 * H), jnp.float32),    # decoder x-gates
        pltpu.VMEM((T_enc * Bb, H), jnp.float32),        # encoder hidden (time-major)
        pltpu.VMEM((T_dec * Bb, H), jnp.float32),        # decoder hidden (time-major)
    ]

    # VMEM budget from actual per-block slabs (double-buffered ins/outs) + headroom.
    def _b(shape):
        n = 4
        for d in shape:
            n *= int(d)
        return n
    block_bytes = (
        2 * (_b((T_enc * Bb, I)) + _b((T_dec * Bb, I))
             + 2 * _b((I, 4 * H)) + 2 * _b((H, 4 * H)) + 2 * _b((1, 4 * H))
             + _b((Bb, T_dec, RESP_PAD)) + _b((Bb, T_dec, ATTN_PAD)))
        + _b((T_enc * Bb, 4 * H)) + _b((T_dec * Bb, 4 * H))
        + _b((T_enc * Bb, H)) + _b((T_dec * Bb, H))
    )
    vmem_limit = min(max(int(1.25 * block_bytes), 16 * 1024 * 1024), 100 * 1024 * 1024)

    resp_p, attn_p = pl.pallas_call(
        attention_lstm_kernel,
        grid=(G,),
        in_specs=in_specs,
        out_specs=out_specs,
        out_shape=(
            jax.ShapeDtypeStruct((B, T_dec, RESP_PAD), jnp.float32),
            jax.ShapeDtypeStruct((B, T_dec, ATTN_PAD), jnp.float32),
        ),
        scratch_shapes=scratch_shapes,
        compiler_params=pltpu.CompilerParams(
            dimension_semantics=("parallel",),           # batch blocks are independent
            vmem_limit_bytes=vmem_limit,
        ),
    )(*args)

    # slice off lane padding and return in the module's (T_dec, B, ...) order
    responses = jnp.transpose(resp_p[:, :, :H2], (1, 0, 2))        # (T_dec, B, 2H)
    attn_weights = jnp.transpose(attn_p[:, :, :T_enc], (1, 0, 2))  # (T_dec, B, T_enc)
    return responses, attn_weights


# ----------------------------------------------------------------------------
# Pure-JAX reference (mirrors the PyTorch forward exactly) for verification
# ----------------------------------------------------------------------------
def _ref_forward(enc_input, dec_input, params, H):
    enc = jnp.transpose(enc_input, (1, 0, 2))
    dec = jnp.transpose(dec_input, (1, 0, 2))
    T_enc, B, _ = enc.shape
    T_dec = dec.shape[0]

    def lstm_step(x, h, c, w_ih, w_hh, b):
        gates = x @ w_ih + h @ w_hh + b
        i_g = jax.nn.sigmoid(gates[:, :H])
        f_g = jax.nn.sigmoid(gates[:, H:2 * H])
        g_g = jnp.tanh(gates[:, 2 * H:3 * H])
        o_g = jax.nn.sigmoid(gates[:, 3 * H:])
        c = f_g * c + i_g * g_g
        h = o_g * jnp.tanh(c)
        return h, c

    h = jnp.zeros((B, H), jnp.float32)
    c = jnp.zeros((B, H), jnp.float32)
    enc_outs = []
    for t in range(T_enc):
        h, c = lstm_step(enc[t], h, c, params["w_ih_e"], params["w_hh_e"], params["b_e"])
        enc_outs.append(h)
    enc_out = jnp.stack(enc_outs)                                   # (T_enc, B, H)

    resps, attns = [], []
    for i in range(T_dec):
        h, c = lstm_step(dec[i], h, c, params["w_ih_d"], params["w_hh_d"], params["b_d"])
        score = jnp.einsum("tbh,bh->bt", enc_out, h)                # (B, T_enc)
        w = jax.nn.softmax(score, axis=-1)
        attn_val = jnp.einsum("bt,tbh->bh", w, enc_out)             # (B, H)
        resps.append(jnp.concatenate([h, attn_val], axis=-1))
        attns.append(w)
    return jnp.stack(resps), jnp.stack(attns)


# ----------------------------------------------------------------------------
# Main
# ----------------------------------------------------------------------------
if __name__ == "__main__":
    # module config: n_layers=1, bidirectional=False (required for the
    # hidden_size*2 concat in the reference forward to be consistent)
    input_size, hidden_size = 16, 32
    batch, enc_seq, dec_seq = 2, 8, 6

    key = jax.random.PRNGKey(0)
    ks = jax.random.split(key, 10)
    k_init = 1.0 / jnp.sqrt(hidden_size)

    def unif(k, shape):
        return jax.random.uniform(k, shape, jnp.float32, -k_init, k_init)

    # PyTorch stores (4H, I)/(4H, H); we pre-transpose to (I, 4H)/(H, 4H).
    params = {
        "w_ih_e": unif(ks[0], (4 * hidden_size, input_size)).T,
        "w_hh_e": unif(ks[1], (4 * hidden_size, hidden_size)).T,
        "b_e": (unif(ks[2], (4 * hidden_size,)) + unif(ks[3], (4 * hidden_size,)))
        .reshape(1, 4 * hidden_size),
        "w_ih_d": unif(ks[4], (4 * hidden_size, input_size)).T,
        "w_hh_d": unif(ks[5], (4 * hidden_size, hidden_size)).T,
        "b_d": (unif(ks[6], (4 * hidden_size,)) + unif(ks[7], (4 * hidden_size,)))
        .reshape(1, 4 * hidden_size),
    }

    enc_input = jax.random.normal(ks[8], (batch, enc_seq, input_size), jnp.float32)
    dec_input = jax.random.normal(ks[9], (batch, dec_seq, input_size), jnp.float32)

    # Default batch_block = whole batch (one grid step; right choice on 1-TC
    # v5e/v6e). On v7x call with batch_block=batch // 2.
    responses, attn_weights = attention_lstm_forward(enc_input, dec_input, params)
    responses = jax.block_until_ready(responses)
    attn_weights = jax.block_until_ready(attn_weights)

    resp_ref, attn_ref = _ref_forward(enc_input, dec_input, params, hidden_size)

    assert responses.shape == (dec_seq, batch, 2 * hidden_size)
    assert attn_weights.shape == (dec_seq, batch, enc_seq)
    assert jnp.allclose(responses, resp_ref, rtol=2e-4, atol=5e-5)
    assert jnp.allclose(attn_weights, attn_ref, rtol=2e-4, atol=5e-5)

    # TODO(synk): the PyTorch module returns attention weights as a Python list
    # of per-step numpy arrays (.data.cpu().numpy()); here they are returned
    # stacked as a single (dec_seq, batch, enc_seq) device array.
    print("KERNEL_OK")
</pallas_src>

<mosaic_0001>
module attributes {stable_mosaic.version = 11 : i64} {
  func.func @attention_lstm_kernel(%arg0: i32, %arg1: memref<1x16x16xf32, #tpu.memory_space<vmem>>, %arg2: memref<1x12x16xf32, #tpu.memory_space<vmem>>, %arg3: memref<16x128xf32, #tpu.memory_space<vmem>>, %arg4: memref<32x128xf32, #tpu.memory_space<vmem>>, %arg5: memref<1x128xf32, #tpu.memory_space<vmem>>, %arg6: memref<16x128xf32, #tpu.memory_space<vmem>>, %arg7: memref<32x128xf32, #tpu.memory_space<vmem>>, %arg8: memref<1x128xf32, #tpu.memory_space<vmem>>, %arg9: memref<2x6x128xf32, #tpu.memory_space<vmem>>, %arg10: memref<2x6x128xf32, #tpu.memory_space<vmem>>, %arg11: memref<16x128xf32, #tpu.memory_space<vmem>>, %arg12: memref<12x128xf32, #tpu.memory_space<vmem>>, %arg13: memref<16x32xf32, #tpu.memory_space<vmem>>, %arg14: memref<12x32xf32, #tpu.memory_space<vmem>>) attributes {dimension_semantics = [#tpu.dimension_semantics<parallel>], iteration_bounds = array<i64: 1>, scalar_prefetch = 0 : i64, scratch_operands = 4 : i64, tpu.core_type = #tpu.core_type<tc>, window_params = [{transform_indices = @transform_0, window_bounds = array<i64: 1, 16, 16>}, {transform_indices = @transform_1, window_bounds = array<i64: 1, 12, 16>}, {pipeline_mode = #tpu.pipeline_mode<synchronous>, transform_indices = @transform_2, window_bounds = array<i64: 16, 128>}, {pipeline_mode = #tpu.pipeline_mode<synchronous>, transform_indices = @transform_3, window_bounds = array<i64: 32, 128>}, {pipeline_mode = #tpu.pipeline_mode<synchronous>, transform_indices = @transform_4, window_bounds = array<i64: 1, 128>}, {pipeline_mode = #tpu.pipeline_mode<synchronous>, transform_indices = @transform_5, window_bounds = array<i64: 16, 128>}, {pipeline_mode = #tpu.pipeline_mode<synchronous>, transform_indices = @transform_6, window_bounds = array<i64: 32, 128>}, {pipeline_mode = #tpu.pipeline_mode<synchronous>, transform_indices = @transform_7, window_bounds = array<i64: 1, 128>}, {transform_indices = @transform_8, window_bounds = array<i64: 2, 6, 128>}, {transform_indices = @transform_9, window_bounds = array<i64: 2, 6, 128>}]} {
    %c0 = arith.constant 0 : index
    %c0_0 = arith.constant 0 : index
    %c0_1 = arith.constant 0 : index
    %0 = vector.load %arg1[%c0, %c0_0, %c0_1] : memref<1x16x16xf32, #tpu.memory_space<vmem>>, vector<1x16x16xf32>
    %1 = vector.shape_cast %0 : vector<1x16x16xf32> to vector<16x16xf32>
    %c0_2 = arith.constant 0 : index
    %c0_3 = arith.constant 0 : index
    %2 = vector.load %arg3[%c0_2, %c0_3] : memref<16x128xf32, #tpu.memory_space<vmem>>, vector<16x128xf32>
    %cst = arith.constant dense<0.000000e+00> : vector<16x128xf32>
    %3 = tpu.matmul %1, %2, %cst {dimension_numbers = #tpu.dot_dimension_numbers<[1], [0], [0], [1], [0, 0, 1, 1], [], []>} : vector<16x16xf32>, vector<16x128xf32>, vector<16x128xf32> -> vector<16x128xf32>
    %c0_4 = arith.constant 0 : index
    %c0_5 = arith.constant 0 : index
    %4 = vector.load %arg5[%c0_4, %c0_5] : memref<1x128xf32, #tpu.memory_space<vmem>>, vector<1x128xf32>
    %5 = vector.broadcast %4 : vector<1x128xf32> to vector<16x128xf32>
    %6 = arith.addf %3, %5 : vector<16x128xf32>
    %c0_6 = arith.constant 0 : index
    %c0_7 = arith.constant 0 : index
    %7 = vector.load %arg11[%c0_6, %c0_7] : memref<16x128xf32, #tpu.memory_space<vmem>>, vector<16x128xf32>
    tpu.vector_store %arg11[%c0_6, %c0_7], %6 {strides = array<i32>} : memref<16x128xf32, #tpu.memory_space<vmem>>, vector<16x128xf32>,
    %c0_8 = arith.constant 0 : index
    %c0_9 = arith.constant 0 : index
    %c0_10 = arith.constant 0 : index
    %8 = vector.load %arg2[%c0_8, %c0_9, %c0_10] : memref<1x12x16xf32, #tpu.memory_space<vmem>>, vector<1x12x16xf32>
    %9 = vector.shape_cast %8 : vector<1x12x16xf32> to vector<12x16xf32>
    %c0_11 = arith.constant 0 : index
    %c0_12 = arith.constant 0 : index
    %10 = vector.load %arg6[%c0_11, %c0_12] : memref<16x128xf32, #tpu.memory_space<vmem>>, vector<16x128xf32>
    %cst_13 = arith.constant dense<0.000000e+00> : vector<12x128xf32>
    %11 = tpu.matmul %9, %10, %cst_13 {dimension_numbers = #tpu.dot_dimension_numbers<[1], [0], [0], [1], [0, 0, 1, 1], [], []>} : vector<12x16xf32>, vector<16x128xf32>, vector<12x128xf32> -> vector<12x128xf32>
    %c0_14 = arith.constant 0 : index
    %c0_15 = arith.constant 0 : index
    %12 = vector.load %arg8[%c0_14, %c0_15] : memref<1x128xf32, #tpu.memory_space<vmem>>, vector<1x128xf32>
    %13 = vector.broadcast %12 : vector<1x128xf32> to vector<12x128xf32>
    %14 = arith.addf %11, %13 : vector<12x128xf32>
    %c0_16 = arith.constant 0 : index
    %c0_17 = arith.constant 0 : index
    %15 = vector.load %arg12[%c0_16, %c0_17] : memref<12x128xf32, #tpu.memory_space<vmem>>, vector<12x128xf32>
    tpu.vector_store %arg12[%c0_16, %c0_17], %14 {strides = array<i32>} : memref<12x128xf32, #tpu.memory_space<vmem>>, vector<12x128xf32>,
    %cst_18 = arith.constant 0.000000e+00 : f32
    %16 = vector.broadcast %cst_18 : f32 to vector<2x32xf32>
    %cst_19 = arith.constant 0.000000e+00 : f32
    %17 = vector.broadcast %cst_19 : f32 to vector<2x32xf32>
    %c0_i32 = arith.constant 0 : i32
    %c2_i32 = arith.constant 2 : i32
    %18 = arith.muli %c0_i32, %c2_i32 : i32
    %19 = arith.index_cast %18 : i32 to index
    %c0_20 = arith.constant 0 : index
    %20 = vector.load %arg11[%19, %c0_20] : memref<16x128xf32, #tpu.memory_space<vmem>>, vector<2x128xf32>
    %c0_21 = arith.constant 0 : index
    %c0_22 = arith.constant 0 : index
    %21 = vector.load %arg4[%c0_21, %c0_22] : memref<32x128xf32, #tpu.memory_space<vmem>>, vector<32x128xf32>
    %cst_23 = arith.constant dense<0.000000e+00> : vector<2x128xf32>
    %22 = tpu.matmul %16, %21, %cst_23 {dimension_numbers = #tpu.dot_dimension_numbers<[1], [0], [0], [1], [0, 0, 1, 1], [], []>} : vector<2x32xf32>, vector<32x128xf32>, vector<2x128xf32> -> vector<2x128xf32>
    %23 = arith.addf %20, %22 : vector<2x128xf32>
    %24 = arith.negf %23 : vector<2x128xf32>
    %25 = math.exp %24 : vector<2x128xf32>
    %cst_24 = arith.constant 1.000000e+00 : f32
    %26 = vector.broadcast %cst_24 : f32 to vector<2x128xf32>
    %27 = arith.addf %26, %25 : vector<2x128xf32>
    %28 = arith.divf %26, %27 : vector<2x128xf32>
    %29 = math.tanh %23 : vector<2x128xf32>
    %30 = vector.extract_strided_slice %28 {offsets = [0, 0], sizes = [2, 32], strides = [1, 1]} : vector<2x128xf32> to vector<2x32xf32>
    %31 = vector.extract_strided_slice %28 {offsets = [0, 32], sizes = [2, 32], strides = [1, 1]} : vector<2x128xf32> to vector<2x32xf32>
    %32 = vector.extract_strided_slice %29 {offsets = [0, 64], sizes = [2, 32], strides = [1, 1]} : vector<2x128xf32> to vector<2x32xf32>
    %33 = vector.extract_strided_slice %28 {offsets = [0, 96], sizes = [2, 32], strides = [1, 1]} : vector<2x128xf32> to vector<2x32xf32>
    %34 = arith.mulf %31, %17 : vector<2x32xf32>
    %35 = arith.mulf %30, %32 : vector<2x32xf32>
    %36 = arith.addf %34, %35 : vector<2x32xf32>
    %37 = math.tanh %36 : vector<2x32xf32>
    %38 = arith.mulf %33, %37 : vector<2x32xf32>
    %c2_i32_25 = arith.constant 2 : i32
    %39 = arith.muli %c0_i32, %c2_i32_25 : i32
    %40 = arith.index_cast %39 : i32 to index
    %c0_26 = arith.constant 0 : index
    %41 = vector.load %arg13[%40, %c0_26] : memref<16x32xf32, #tpu.memory_space<vmem>>, vector<2x32xf32>
    tpu.vector_store %arg13[%40, %c0_26], %38 {strides = array<i32>} : memref<16x32xf32, #tpu.memory_space<vmem>>, vector<2x32xf32>,
    %c1_i32 = arith.constant 1 : i32
    %c2_i32_27 = arith.constant 2 : i32
    %42 = arith.muli %c1_i32, %c2_i32_27 : i32
    %43 = arith.index_cast %42 : i32 to index
    %c0_28 = arith.constant 0 : index
    %44 = vector.load %arg11[%43, %c0_28] : memref<16x128xf32, #tpu.memory_space<vmem>>, vector<2x128xf32>
    %c0_29 = arith.constant 0 : index
    %c0_30 = arith.constant 0 : index
    %45 = vector.load %arg4[%c0_29, %c0_30] : memref<32x128xf32, #tpu.memory_space<vmem>>, vector<32x128xf32>
    %cst_31 = arith.constant dense<0.000000e+00> : vector<2x128xf32>
    %46 = tpu.matmul %38, %45, %cst_31 {dimension_numbers = #tpu.dot_dimension_numbers<[1], [0], [0], [1], [0, 0, 1, 1], [], []>} : vector<2x32xf32>, vector<32x128xf32>, vector<2x128xf32> -> vector<2x128xf32>
    %47 = arith.addf %44, %46 : vector<2x128xf32>
    %48 = arith.negf %47 : vector<2x128xf32>
    %49 = math.exp %48 : vector<2x128xf32>
    %cst_32 = arith.constant 1.000000e+00 : f32
    %50 = vector.broadcast %cst_32 : f32 to vector<2x128xf32>
    %51 = arith.addf %50, %49 : vector<2x128xf32>
    %52 = arith.divf %50, %51 : vector<2x128xf32>
    %53 = math.tanh %47 : vector<2x128xf32>
    %54 = vector.extract_strided_slice %52 {offsets = [0, 0], sizes = [2, 32], strides = [1, 1]} : vector<2x128xf32> to vector<2x32xf32>
    %55 = vector.extract_strided_slice %52 {offsets = [0, 32], sizes = [2, 32], strides = [1, 1]} : vector<2x128xf32> to vector<2x32xf32>
    %56 = vector.extract_strided_slice %53 {offsets = [0, 64], sizes = [2, 32], strides = [1, 1]} : vector<2x128xf32> to vector<2x32xf32>
    %57 = vector.extract_strided_slice %52 {offsets = [0, 96], sizes = [2, 32], strides = [1, 1]} : vector<2x128xf32> to vector<2x32xf32>
    %58 = arith.mulf %55, %36 : vector<2x32xf32>
    %59 = arith.mulf %54, %56 : vector<2x32xf32>
    %60 = arith.addf %58, %59 : vector<2x32xf32>
    %61 = math.tanh %60 : vector<2x32xf32>
    %62 = arith.mulf %57, %61 : vector<2x32xf32>
    %c2_i32_33 = arith.constant 2 : i32
    %63 = arith.muli %c1_i32, %c2_i32_33 : i32
    %64 = arith.index_cast %63 : i32 to index
    %c0_34 = arith.constant 0 : index
    %65 = vector.load %arg13[%64, %c0_34] : memref<16x32xf32, #tpu.memory_space<vmem>>, vector<2x32xf32>
    tpu.vector_store %arg13[%64, %c0_34], %62 {strides = array<i32>} : memref<16x32xf32, #tpu.memory_space<vmem>>, vector<2x32xf32>,
    %c2_i32_35 = arith.constant 2 : i32
    %c2_i32_36 = arith.constant 2 : i32
    %66 = arith.muli %c2_i32_35, %c2_i32_36 : i32
    %67 = arith.index_cast %66 : i32 to index
    %c0_37 = arith.constant 0 : index
    %68 = vector.load %arg11[%67, %c0_37] : memref<16x128xf32, #tpu.memory_space<vmem>>, vector<2x128xf32>
    %c0_38 = arith.constant 0 : index
    %c0_39 = arith.constant 0 : index
    %69 = vector.load %arg4[%c0_38, %c0_39] : memref<32x128xf32, #tpu.memory_space<vmem>>, vector<32x128xf32>
    %cst_40 = arith.constant dense<0.000000e+00> : vector<2x128xf32>
    %70 = tpu.matmul %62, %69, %cst_40 {dimension_numbers = #tpu.dot_dimension_numbers<[1], [0], [0], [1], [0, 0, 1, 1], [], []>} : vector<2x32xf32>, vector<32x128xf32>, vector<2x128xf32> -> vector<2x128xf32>
    %71 = arith.addf %68, %70 : vector<2x128xf32>
    %72 = arith.negf %71 : vector<2x128xf32>
    %73 = math.exp %72 : vector<2x128xf32>
    %cst_41 = arith.constant 1.000000e+00 : f32
    %74 = vector.broadcast %cst_41 : f32 to vector<2x128xf32>
    %75 = arith.addf %74, %73 : vector<2x128xf32>
    %76 = arith.divf %74, %75 : vector<2x128xf32>
    %77 = math.tanh %71 : vector<2x128xf32>
    %78 = vector.extract_strided_slice %76 {offsets = [0, 0], sizes = [2, 32], strides = [1, 1]} : vector<2x128xf32> to vector<2x32xf32>
    %79 = vector.extract_strided_slice %76 {offsets = [0, 32], sizes = [2, 32], strides = [1, 1]} : vector<2x128xf32> to vector<2x32xf32>
    %80 = vector.extract_strided_slice %77 {offsets = [0, 64], sizes = [2, 32], strides = [1, 1]} : vector<2x128xf32> to vector<2x32xf32>
    %81 = vector.extract_strided_slice %76 {offsets = [0, 96], sizes = [2, 32], strides = [1, 1]} : vector<2x128xf32> to vector<2x32xf32>
    %82 = arith.mulf %79, %60 : vector<2x32xf32>
    %83 = arith.mulf %78, %80 : vector<2x32xf32>
    %84 = arith.addf %82, %83 : vector<2x32xf32>
    %85 = math.tanh %84 : vector<2x32xf32>
    %86 = arith.mulf %81, %85 : vector<2x32xf32>
    %c2_i32_42 = arith.constant 2 : i32
    %87 = arith.muli %c2_i32_35, %c2_i32_42 : i32
    %88 = arith.index_cast %87 : i32 to index
    %c0_43 = arith.constant 0 : index
    %89 = vector.load %arg13[%88, %c0_43] : memref<16x32xf32, #tpu.memory_space<vmem>>, vector<2x32xf32>
    tpu.vector_store %arg13[%88, %c0_43], %86 {strides = array<i32>} : memref<16x32xf32, #tpu.memory_space<vmem>>, vector<2x32xf32>,
    %c3_i32 = arith.constant 3 : i32
    %c2_i32_44 = arith.constant 2 : i32
    %90 = arith.muli %c3_i32, %c2_i32_44 : i32
    %91 = arith.index_cast %90 : i32 to index
    %c0_45 = arith.constant 0 : index
    %92 = vector.load %arg11[%91, %c0_45] : memref<16x128xf32, #tpu.memory_space<vmem>>, vector<2x128xf32>
    %c0_46 = arith.constant 0 : index
    %c0_47 = arith.constant 0 : index
    %93 = vector.load %arg4[%c0_46, %c0_47] : memref<32x128xf32, #tpu.memory_space<vmem>>, vector<32x128xf32>
    %cst_48 = arith.constant dense<0.000000e+00> : vector<2x128xf32>
    %94 = tpu.matmul %86, %93, %cst_48 {dimension_numbers = #tpu.dot_dimension_numbers<[1], [0], [0], [1], [0, 0, 1, 1], [], []>} : vector<2x32xf32>, vector<32x128xf32>, vector<2x128xf32> -> vector<2x128xf32>
    %95 = arith.addf %92, %94 : vector<2x128xf32>
    %96 = arith.negf %95 : vector<2x128xf32>
    %97 = math.exp %96 : vector<2x128xf32>
    %cst_49 = arith.constant 1.000000e+00 : f32
    %98 = vector.broadcast %cst_49 : f32 to vector<2x128xf32>
    %99 = arith.addf %98, %97 : vector<2x128xf32>
    %100 = arith.divf %98, %99 : vector<2x128xf32>
    %101 = math.tanh %95 : vector<2x128xf32>
    %102 = vector.extract_strided_slice %100 {offsets = [0, 0], sizes = [2, 32], strides = [1, 1]} : vector<2x128xf32> to vector<2x32xf32>
    %103 = vector.extract_strided_slice %100 {offsets = [0, 32], sizes = [2, 32], strides = [1, 1]} : vector<2x128xf32> to vector<2x32xf32>
    %104 = vector.extract_strided_slice %101 {offsets = [0, 64], sizes = [2, 32], strides = [1, 1]} : vector<2x128xf32> to vector<2x32xf32>
    %105 = vector.extract_strided_slice %100 {offsets = [0, 96], sizes = [2, 32], strides = [1, 1]} : vector<2x128xf32> to vector<2x32xf32>
    %106 = arith.mulf %103, %84 : vector<2x32xf32>
    %107 = arith.mulf %102, %104 : vector<2x32xf32>
    %108 = arith.addf %106, %107 : vector<2x32xf32>
    %109 = math.tanh %108 : vector<2x32xf32>
    %110 = arith.mulf %105, %109 : vector<2x32xf32>
    %c2_i32_50 = arith.constant 2 : i32
    %111 = arith.muli %c3_i32, %c2_i32_50 : i32
    %112 = arith.index_cast %111 : i32 to index
    %c0_51 = arith.constant 0 : index
    %113 = vector.load %arg13[%112, %c0_51] : memref<16x32xf32, #tpu.memory_space<vmem>>, vector<2x32xf32>
    tpu.vector_store %arg13[%112, %c0_51], %110 {strides = array<i32>} : memref<16x32xf32, #tpu.memory_space<vmem>>, vector<2x32xf32>,
    %c4_i32 = arith.constant 4 : i32
    %c2_i32_52 = arith.constant 2 : i32
    %114 = arith.muli %c4_i32, %c2_i32_52 : i32
    %115 = arith.index_cast %114 : i32 to index
    %c0_53 = arith.constant 0 : index
    %116 = vector.load %arg11[%115, %c0_53] : memref<16x128xf32, #tpu.memory_space<vmem>>, vector<2x128xf32>
    %c0_54 = arith.constant 0 : index
    %c0_55 = arith.constant 0 : index
    %117 = vector.load %arg4[%c0_54, %c0_55] : memref<32x128xf32, #tpu.memory_space<vmem>>, vector<32x128xf32>
    %cst_56 = arith.constant dense<0.000000e+00> : vector<2x128xf32>
    %118 = tpu.matmul %110, %117, %cst_56 {dimension_numbers = #tpu.dot_dimension_numbers<[1], [0], [0], [1], [0, 0, 1, 1], [], []>} : vector<2x32xf32>, vector<32x128xf32>, vector<2x128xf32> -> vector<2x128xf32>
    %119 = arith.addf %116, %118 : vector<2x128xf32>
    %120 = arith.negf %119 : vector<2x128xf32>
    %121 = math.exp %120 : vector<2x128xf32>
    %cst_57 = arith.constant 1.000000e+00 : f32
    %122 = vector.broadcast %cst_57 : f32 to vector<2x128xf32>
    %123 = arith.addf %122, %121 : vector<2x128xf32>
    %124 = arith.divf %122, %123 : vector<2x128xf32>
    %125 = math.tanh %119 : vector<2x128xf32>
    %126 = vector.extract_strided_slice %124 {offsets = [0, 0], sizes = [2, 32], strides = [1, 1]} : vector<2x128xf32> to vector<2x32xf32>
    %127 = vector.extract_strided_slice %124 {offsets = [0, 32], sizes = [2, 32], strides = [1, 1]} : vector<2x128xf32> to vector<2x32xf32>
    %128 = vector.extract_strided_slice %125 {offsets = [0, 64], sizes = [2, 32], strides = [1, 1]} : vector<2x128xf32> to vector<2x32xf32>
    %129 = vector.extract_strided_slice %124 {offsets = [0, 96], sizes = [2, 32], strides = [1, 1]} : vector<2x128xf32> to vector<2x32xf32>
    %130 = arith.mulf %127, %108 : vector<2x32xf32>
    %131 = arith.mulf %126, %128 : vector<2x32xf32>
    %132 = arith.addf %130, %131 : vector<2x32xf32>
    %133 = math.tanh %132 : vector<2x32xf32>
    %134 = arith.mulf %129, %133 : vector<2x32xf32>
    %c2_i32_58 = arith.constant 2 : i32
    %135 = arith.muli %c4_i32, %c2_i32_58 : i32
    %136 = arith.index_cast %135 : i32 to index
    %c0_59 = arith.constant 0 : index
    %137 = vector.load %arg13[%136, %c0_59] : memref<16x32xf32, #tpu.memory_space<vmem>>, vector<2x32xf32>
    tpu.vector_store %arg13[%136, %c0_59], %134 {strides = array<i32>} : memref<16x32xf32, #tpu.memory_space<vmem>>, vector<2x32xf32>,
    %c5_i32 = arith.constant 5 : i32
    %c2_i32_60 = arith.constant 2 : i32
    %138 = arith.muli %c5_i32, %c2_i32_60 : i32
    %139 = arith.index_cast %138 : i32 to index
    %c0_61 = arith.constant 0 : index
    %140 = vector.load %arg11[%139, %c0_61] : memref<16x128xf32, #tpu.memory_space<vmem>>, vector<2x128xf32>
    %c0_62 = arith.constant 0 : index
    %c0_63 = arith.constant 0 : index
    %141 = vector.load %arg4[%c0_62, %c0_63] : memref<32x128xf32, #tpu.memory_space<vmem>>, vector<32x128xf32>
    %cst_64 = arith.constant dense<0.000000e+00> : vector<2x128xf32>
    %142 = tpu.matmul %134, %141, %cst_64 {dimension_numbers = #tpu.dot_dimension_numbers<[1], [0], [0], [1], [0, 0, 1, 1], [], []>} : vector<2x32xf32>, vector<32x128xf32>, vector<2x128xf32> -> vector<2x128xf32>
    %143 = arith.addf %140, %142 : vector<2x128xf32>
    %144 = arith.negf %143 : vector<2x128xf32>
    %145 = math.exp %144 : vector<2x128xf32>
    %cst_65 = arith.constant 1.000000e+00 : f32
    %146 = vector.broadcast %cst_65 : f32 to vector<2x128xf32>
    %147 = arith.addf %146, %145 : vector<2x128xf32>
    %148 = arith.divf %146, %147 : vector<2x128xf32>
    %149 = math.tanh %143 : vector<2x128xf32>
    %150 = vector.extract_strided_slice %148 {offsets = [0, 0], sizes = [2, 32], strides = [1, 1]} : vector<2x128xf32> to vector<2x32xf32>
    %151 = vector.extract_strided_slice %148 {offsets = [0, 32], sizes = [2, 32], strides = [1, 1]} : vector<2x128xf32> to vector<2x32xf32>
    %152 = vector.extract_strided_slice %149 {offsets = [0, 64], sizes = [2, 32], strides = [1, 1]} : vector<2x128xf32> to vector<2x32xf32>
    %153 = vector.extract_strided_slice %148 {offsets = [0, 96], sizes = [2, 32], strides = [1, 1]} : vector<2x128xf32> to vector<2x32xf32>
    %154 = arith.mulf %151, %132 : vector<2x32xf32>
    %155 = arith.mulf %150, %152 : vector<2x32xf32>
    %156 = arith.addf %154, %155 : vector<2x32xf32>
    %157 = math.tanh %156 : vector<2x32xf32>
    %158 = arith.mulf %153, %157 : vector<2x32xf32>
    %c2_i32_66 = arith.constant 2 : i32
    %159 = arith.muli %c5_i32, %c2_i32_66 : i32
    %160 = arith.index_cast %159 : i32 to index
    %c0_67 = arith.constant 0 : index
    %161 = vector.load %arg13[%160, %c0_67] : memref<16x32xf32, #tpu.memory_space<vmem>>, vector<2x32xf32>
    tpu.vector_store %arg13[%160, %c0_67], %158 {strides = array<i32>} : memref<16x32xf32, #tpu.memory_space<vmem>>, vector<2x32xf32>,
    %c6_i32 = arith.constant 6 : i32
    %c2_i32_68 = arith.constant 2 : i32
    %162 = arith.muli %c6_i32, %c2_i32_68 : i32
    %163 = arith.index_cast %162 : i32 to index
    %c0_69 = arith.constant 0 : index
    %164 = vector.load %arg11[%163, %c0_69] : memref<16x128xf32, #tpu.memory_space<vmem>>, vector<2x128xf32>
    %c0_70 = arith.constant 0 : index
    %c0_71 = arith.constant 0 : index
    %165 = vector.load %arg4[%c0_70, %c0_71] : memref<32x128xf32, #tpu.memory_space<vmem>>, vector<32x128xf32>
    %cst_72 = arith.constant dense<0.000000e+00> : vector<2x128xf32>
    %166 = tpu.matmul %158, %165, %cst_72 {dimension_numbers = #tpu.dot_dimension_numbers<[1], [0], [0], [1], [0, 0, 1, 1], [], []>} : vector<2x32xf32>, vector<32x128xf32>, vector<2x128xf32> -> vector<2x128xf32>
    %167 = arith.addf %164, %166 : vector<2x128xf32>
    %168 = arith.negf %167 : vector<2x128xf32>
    %169 = math.exp %168 : vector<2x128xf32>
    %cst_73 = arith.constant 1.000000e+00 : f32
    %170 = vector.broadcast %cst_73 : f32 to vector<2x128xf32>
    %171 = arith.addf %170, %169 : vector<2x128xf32>
    %172 = arith.divf %170, %171 : vector<2x128xf32>
    %173 = math.tanh %167 : vector<2x128xf32>
    %174 = vector.extract_strided_slice %172 {offsets = [0, 0], sizes = [2, 32], strides = [1, 1]} : vector<2x128xf32> to vector<2x32xf32>
    %175 = vector.extract_strided_slice %172 {offsets = [0, 32], sizes = [2, 32], strides = [1, 1]} : vector<2x128xf32> to vector<2x32xf32>
    %176 = vector.extract_strided_slice %173 {offsets = [0, 64], sizes = [2, 32], strides = [1, 1]} : vector<2x128xf32> to vector<2x32xf32>
    %177 = vector.extract_strided_slice %172 {offsets = [0, 96], sizes = [2, 32], strides = [1, 1]} : vector<2x128xf32> to vector<2x32xf32>
    %178 = arith.mulf %175, %156 : vector<2x32xf32>
    %179 = arith.mulf %174, %176 : vector<2x32xf32>
    %180 = arith.addf %178, %179 : vector<2x32xf32>
    %181 = math.tanh %180 : vector<2x32xf32>
    %182 = arith.mulf %177, %181 : vector<2x32xf32>
    %c2_i32_74 = arith.constant 2 : i32
    %183 = arith.muli %c6_i32, %c2_i32_74 : i32
    %184 = arith.index_cast %183 : i32 to index
    %c0_75 = arith.constant 0 : index
    %185 = vector.load %arg13[%184, %c0_75] : memref<16x32xf32, #tpu.memory_space<vmem>>, vector<2x32xf32>
    tpu.vector_store %arg13[%184, %c0_75], %182 {strides = array<i32>} : memref<16x32xf32, #tpu.memory_space<vmem>>, vector<2x32xf32>,
    %c7_i32 = arith.constant 7 : i32
    %c2_i32_76 = arith.constant 2 : i32
    %186 = arith.muli %c7_i32, %c2_i32_76 : i32
    %187 = arith.index_cast %186 : i32 to index
    %c0_77 = arith.constant 0 : index
    %188 = vector.load %arg11[%187, %c0_77] : memref<16x128xf32, #tpu.memory_space<vmem>>, vector<2x128xf32>
    %c0_78 = arith.constant 0 : index
    %c0_79 = arith.constant 0 : index
    %189 = vector.load %arg4[%c0_78, %c0_79] : memref<32x128xf32, #tpu.memory_space<vmem>>, vector<32x128xf32>
    %cst_80 = arith.constant dense<0.000000e+00> : vector<2x128xf32>
    %190 = tpu.matmul %182, %189, %cst_80 {dimension_numbers = #tpu.dot_dimension_numbers<[1], [0], [0], [1], [0, 0, 1, 1], [], []>} : vector<2x32xf32>, vector<32x128xf32>, vector<2x128xf32> -> vector<2x128xf32>
    %191 = arith.addf %188, %190 : vector<2x128xf32>
    %192 = arith.negf %191 : vector<2x128xf32>
    %193 = math.exp %192 : vector<2x128xf32>
    %cst_81 = arith.constant 1.000000e+00 : f32
    %194 = vector.broadcast %cst_81 : f32 to vector<2x128xf32>
    %195 = arith.addf %194, %193 : vector<2x128xf32>
    %196 = arith.divf %194, %195 : vector<2x128xf32>
    %197 = math.tanh %191 : vector<2x128xf32>
    %198 = vector.extract_strided_slice %196 {offsets = [0, 0], sizes = [2, 32], strides = [1, 1]} : vector<2x128xf32> to vector<2x32xf32>
    %199 = vector.extract_strided_slice %196 {offsets = [0, 32], sizes = [2, 32], strides = [1, 1]} : vector<2x128xf32> to vector<2x32xf32>
    %200 = vector.extract_strided_slice %197 {offsets = [0, 64], sizes = [2, 32], strides = [1, 1]} : vector<2x128xf32> to vector<2x32xf32>
    %201 = vector.extract_strided_slice %196 {offsets = [0, 96], sizes = [2, 32], strides = [1, 1]} : vector<2x128xf32> to vector<2x32xf32>
    %202 = arith.mulf %199, %180 : vector<2x32xf32>
    %203 = arith.mulf %198, %200 : vector<2x32xf32>
    %204 = arith.addf %202, %203 : vector<2x32xf32>
    %205 = math.tanh %204 : vector<2x32xf32>
    %206 = arith.mulf %201, %205 : vector<2x32xf32>
    %c2_i32_82 = arith.constant 2 : i32
    %207 = arith.muli %c7_i32, %c2_i32_82 : i32
    %208 = arith.index_cast %207 : i32 to index
    %c0_83 = arith.constant 0 : index
    %209 = vector.load %arg13[%208, %c0_83] : memref<16x32xf32, #tpu.memory_space<vmem>>, vector<2x32xf32>
    tpu.vector_store %arg13[%208, %c0_83], %206 {strides = array<i32>} : memref<16x32xf32, #tpu.memory_space<vmem>>, vector<2x32xf32>,
    %c8_i32 = arith.constant 8 : i32
    %c0_i32_84 = arith.constant 0 : i32
    %c2_i32_85 = arith.constant 2 : i32
    %210 = arith.muli %c0_i32_84, %c2_i32_85 : i32
    %211 = arith.index_cast %210 : i32 to index
    %c0_86 = arith.constant 0 : index
    %212 = vector.load %arg12[%211, %c0_86] : memref<12x128xf32, #tpu.memory_space<vmem>>, vector<2x128xf32>
    %c0_87 = arith.constant 0 : index
    %c0_88 = arith.constant 0 : index
    %213 = vector.load %arg7[%c0_87, %c0_88] : memref<32x128xf32, #tpu.memory_space<vmem>>, vector<32x128xf32>
    %cst_89 = arith.constant dense<0.000000e+00> : vector<2x128xf32>
    %214 = tpu.matmul %206, %213, %cst_89 {dimension_numbers = #tpu.dot_dimension_numbers<[1], [0], [0], [1], [0, 0, 1, 1], [], []>} : vector<2x32xf32>, vector<32x128xf32>, vector<2x128xf32> -> vector<2x128xf32>
    %215 = arith.addf %212, %214 : vector<2x128xf32>
    %216 = arith.negf %215 : vector<2x128xf32>
    %217 = math.exp %216 : vector<2x128xf32>
    %cst_90 = arith.constant 1.000000e+00 : f32
    %218 = vector.broadcast %cst_90 : f32 to vector<2x128xf32>
    %219 = arith.addf %218, %217 : vector<2x128xf32>
    %220 = arith.divf %218, %219 : vector<2x128xf32>
    %221 = math.tanh %215 : vector<2x128xf32>
    %222 = vector.extract_strided_slice %220 {offsets = [0, 0], sizes = [2, 32], strides = [1, 1]} : vector<2x128xf32> to vector<2x32xf32>
    %223 = vector.extract_strided_slice %220 {offsets = [0, 32], sizes = [2, 32], strides = [1, 1]} : vector<2x128xf32> to vector<2x32xf32>
    %224 = vector.extract_strided_slice %221 {offsets = [0, 64], sizes = [2, 32], strides = [1, 1]} : vector<2x128xf32> to vector<2x32xf32>
    %225 = vector.extract_strided_slice %220 {offsets = [0, 96], sizes = [2, 32], strides = [1, 1]} : vector<2x128xf32> to vector<2x32xf32>
    %226 = arith.mulf %223, %204 : vector<2x32xf32>
    %227 = arith.mulf %222, %224 : vector<2x32xf32>
    %228 = arith.addf %226, %227 : vector<2x32xf32>
    %229 = math.tanh %228 : vector<2x32xf32>
    %230 = arith.mulf %225, %229 : vector<2x32xf32>
    %c2_i32_91 = arith.constant 2 : i32
    %231 = arith.muli %c0_i32_84, %c2_i32_91 : i32
    %232 = arith.index_cast %231 : i32 to index
    %c0_92 = arith.constant 0 : index
    %233 = vector.load %arg14[%232, %c0_92] : memref<12x32xf32, #tpu.memory_space<vmem>>, vector<2x32xf32>
    tpu.vector_store %arg14[%232, %c0_92], %230 {strides = array<i32>} : memref<12x32xf32, #tpu.memory_space<vmem>>, vector<2x32xf32>,
    %c1_i32_93 = arith.constant 1 : i32
    %c2_i32_94 = arith.constant 2 : i32
    %234 = arith.muli %c1_i32_93, %c2_i32_94 : i32
    %235 = arith.index_cast %234 : i32 to index
    %c0_95 = arith.constant 0 : index
    %236 = vector.load %arg12[%235, %c0_95] : memref<12x128xf32, #tpu.memory_space<vmem>>, vector<2x128xf32>
    %c0_96 = arith.constant 0 : index
    %c0_97 = arith.constant 0 : index
    %237 = vector.load %arg7[%c0_96, %c0_97] : memref<32x128xf32, #tpu.memory_space<vmem>>, vector<32x128xf32>
    %cst_98 = arith.constant dense<0.000000e+00> : vector<2x128xf32>
    %238 = tpu.matmul %230, %237, %cst_98 {dimension_numbers = #tpu.dot_dimension_numbers<[1], [0], [0], [1], [0, 0, 1, 1], [], []>} : vector<2x32xf32>, vector<32x128xf32>, vector<2x128xf32> -> vector<2x128xf32>
    %239 = arith.addf %236, %238 : vector<2x128xf32>
    %240 = arith.negf %239 : vector<2x128xf32>
    %241 = math.exp %240 : vector<2x128xf32>
    %cst_99 = arith.constant 1.000000e+00 : f32
    %242 = vector.broadcast %cst_99 : f32 to vector<2x128xf32>
    %243 = arith.addf %242, %241 : vector<2x128xf32>
    %244 = arith.divf %242, %243 : vector<2x128xf32>
    %245 = math.tanh %239 : vector<2x128xf32>
    %246 = vector.extract_strided_slice %244 {offsets = [0, 0], sizes = [2, 32], strides = [1, 1]} : vector<2x128xf32> to vector<2x32xf32>
    %247 = vector.extract_strided_slice %244 {offsets = [0, 32], sizes = [2, 32], strides = [1, 1]} : vector<2x128xf32> to vector<2x32xf32>
    %248 = vector.extract_strided_slice %245 {offsets = [0, 64], sizes = [2, 32], strides = [1, 1]} : vector<2x128xf32> to vector<2x32xf32>
    %249 = vector.extract_strided_slice %244 {offsets = [0, 96], sizes = [2, 32], strides = [1, 1]} : vector<2x128xf32> to vector<2x32xf32>
    %250 = arith.mulf %247, %228 : vector<2x32xf32>
    %251 = arith.mulf %246, %248 : vector<2x32xf32>
    %252 = arith.addf %250, %251 : vector<2x32xf32>
    %253 = math.tanh %252 : vector<2x32xf32>
    %254 = arith.mulf %249, %253 : vector<2x32xf32>
    %c2_i32_100 = arith.constant 2 : i32
    %255 = arith.muli %c1_i32_93, %c2_i32_100 : i32
    %256 = arith.index_cast %255 : i32 to index
    %c0_101 = arith.constant 0 : index
    %257 = vector.load %arg14[%256, %c0_101] : memref<12x32xf32, #tpu.memory_space<vmem>>, vector<2x32xf32>
    tpu.vector_store %arg14[%256, %c0_101], %254 {strides = array<i32>} : memref<12x32xf32, #tpu.memory_space<vmem>>, vector<2x32xf32>,
    %c2_i32_102 = arith.constant 2 : i32
    %c2_i32_103 = arith.constant 2 : i32
    %258 = arith.muli %c2_i32_102, %c2_i32_103 : i32
    %259 = arith.index_cast %258 : i32 to index
    %c0_104 = arith.constant 0 : index
    %260 = vector.load %arg12[%259, %c0_104] : memref<12x128xf32, #tpu.memory_space<vmem>>, vector<2x128xf32>
    %c0_105 = arith.constant 0 : index
    %c0_106 = arith.constant 0 : index
    %261 = vector.load %arg7[%c0_105, %c0_106] : memref<32x128xf32, #tpu.memory_space<vmem>>, vector<32x128xf32>
    %cst_107 = arith.constant dense<0.000000e+00> : vector<2x128xf32>
    %262 = tpu.matmul %254, %261, %cst_107 {dimension_numbers = #tpu.dot_dimension_numbers<[1], [0], [0], [1], [0, 0, 1, 1], [], []>} : vector<2x32xf32>, vector<32x128xf32>, vector<2x128xf32> -> vector<2x128xf32>
    %263 = arith.addf %260, %262 : vector<2x128xf32>
    %264 = arith.negf %263 : vector<2x128xf32>
    %265 = math.exp %264 : vector<2x128xf32>
    %cst_108 = arith.constant 1.000000e+00 : f32
    %266 = vector.broadcast %cst_108 : f32 to vector<2x128xf32>
    %267 = arith.addf %266, %265 : vector<2x128xf32>
    %268 = arith.divf %266, %267 : vector<2x128xf32>
    %269 = math.tanh %263 : vector<2x128xf32>
    %270 = vector.extract_strided_slice %268 {offsets = [0, 0], sizes = [2, 32], strides = [1, 1]} : vector<2x128xf32> to vector<2x32xf32>
    %271 = vector.extract_strided_slice %268 {offsets = [0, 32], sizes = [2, 32], strides = [1, 1]} : vector<2x128xf32> to vector<2x32xf32>
    %272 = vector.extract_strided_slice %269 {offsets = [0, 64], sizes = [2, 32], strides = [1, 1]} : vector<2x128xf32> to vector<2x32xf32>
    %273 = vector.extract_strided_slice %268 {offsets = [0, 96], sizes = [2, 32], strides = [1, 1]} : vector<2x128xf32> to vector<2x32xf32>
    %274 = arith.mulf %271, %252 : vector<2x32xf32>
    %275 = arith.mulf %270, %272 : vector<2x32xf32>
    %276 = arith.addf %274, %275 : vector<2x32xf32>
    %277 = math.tanh %276 : vector<2x32xf32>
    %278 = arith.mulf %273, %277 : vector<2x32xf32>
    %c2_i32_109 = arith.constant 2 : i32
    %279 = arith.muli %c2_i32_102, %c2_i32_109 : i32
    %280 = arith.index_cast %279 : i32 to index
    %c0_110 = arith.constant 0 : index
    %281 = vector.load %arg14[%280, %c0_110] : memref<12x32xf32, #tpu.memory_space<vmem>>, vector<2x32xf32>
    tpu.vector_store %arg14[%280, %c0_110], %278 {strides = array<i32>} : memref<12x32xf32, #tpu.memory_space<vmem>>, vector<2x32xf32>,
    %c3_i32_111 = arith.constant 3 : i32
    %c2_i32_112 = arith.constant 2 : i32
    %282 = arith.muli %c3_i32_111, %c2_i32_112 : i32
    %283 = arith.index_cast %282 : i32 to index
    %c0_113 = arith.constant 0 : index
    %284 = vector.load %arg12[%283, %c0_113] : memref<12x128xf32, #tpu.memory_space<vmem>>, vector<2x128xf32>
    %c0_114 = arith.constant 0 : index
    %c0_115 = arith.constant 0 : index
    %285 = vector.load %arg7[%c0_114, %c0_115] : memref<32x128xf32, #tpu.memory_space<vmem>>, vector<32x128xf32>
    %cst_116 = arith.constant dense<0.000000e+00> : vector<2x128xf32>
    %286 = tpu.matmul %278, %285, %cst_116 {dimension_numbers = #tpu.dot_dimension_numbers<[1], [0], [0], [1], [0, 0, 1, 1], [], []>} : vector<2x32xf32>, vector<32x128xf32>, vector<2x128xf32> -> vector<2x128xf32>
    %287 = arith.addf %284, %286 : vector<2x128xf32>
    %288 = arith.negf %287 : vector<2x128xf32>
    %289 = math.exp %288 : vector<2x128xf32>
    %cst_117 = arith.constant 1.000000e+00 : f32
    %290 = vector.broadcast %cst_117 : f32 to vector<2x128xf32>
    %291 = arith.addf %290, %289 : vector<2x128xf32>
    %292 = arith.divf %290, %291 : vector<2x128xf32>
    %293 = math.tanh %287 : vector<2x128xf32>
    %294 = vector.extract_strided_slice %292 {offsets = [0, 0], sizes = [2, 32], strides = [1, 1]} : vector<2x128xf32> to vector<2x32xf32>
    %295 = vector.extract_strided_slice %292 {offsets = [0, 32], sizes = [2, 32], strides = [1, 1]} : vector<2x128xf32> to vector<2x32xf32>
    %296 = vector.extract_strided_slice %293 {offsets = [0, 64], sizes = [2, 32], strides = [1, 1]} : vector<2x128xf32> to vector<2x32xf32>
    %297 = vector.extract_strided_slice %292 {offsets = [0, 96], sizes = [2, 32], strides = [1, 1]} : vector<2x128xf32> to vector<2x32xf32>
    %298 = arith.mulf %295, %276 : vector<2x32xf32>
    %299 = arith.mulf %294, %296 : vector<2x32xf32>
    %300 = arith.addf %298, %299 : vector<2x32xf32>
    %301 = math.tanh %300 : vector<2x32xf32>
    %302 = arith.mulf %297, %301 : vector<2x32xf32>
    %c2_i32_118 = arith.constant 2 : i32
    %303 = arith.muli %c3_i32_111, %c2_i32_118 : i32
    %304 = arith.index_cast %303 : i32 to index
    %c0_119 = arith.constant 0 : index
    %305 = vector.load %arg14[%304, %c0_119] : memref<12x32xf32, #tpu.memory_space<vmem>>, vector<2x32xf32>
    tpu.vector_store %arg14[%304, %c0_119], %302 {strides = array<i32>} : memref<12x32xf32, #tpu.memory_space<vmem>>, vector<2x32xf32>,
    %c4_i32_120 = arith.constant 4 : i32
    %c2_i32_121 = arith.constant 2 : i32
    %306 = arith.muli %c4_i32_120, %c2_i32_121 : i32
    %307 = arith.index_cast %306 : i32 to index
    %c0_122 = arith.constant 0 : index
    %308 = vector.load %arg12[%307, %c0_122] : memref<12x128xf32, #tpu.memory_space<vmem>>, vector<2x128xf32>
    %c0_123 = arith.constant 0 : index
    %c0_124 = arith.constant 0 : index
    %309 = vector.load %arg7[%c0_123, %c0_124] : memref<32x128xf32, #tpu.memory_space<vmem>>, vector<32x128xf32>
    %cst_125 = arith.constant dense<0.000000e+00> : vector<2x128xf32>
    %310 = tpu.matmul %302, %309, %cst_125 {dimension_numbers = #tpu.dot_dimension_numbers<[1], [0], [0], [1], [0, 0, 1, 1], [], []>} : vector<2x32xf32>, vector<32x128xf32>, vector<2x128xf32> -> vector<2x128xf32>
    %311 = arith.addf %308, %310 : vector<2x128xf32>
    %312 = arith.negf %311 : vector<2x128xf32>
    %313 = math.exp %312 : vector<2x128xf32>
    %cst_126 = arith.constant 1.000000e+00 : f32
    %314 = vector.broadcast %cst_126 : f32 to vector<2x128xf32>
    %315 = arith.addf %314, %313 : vector<2x128xf32>
    %316 = arith.divf %314, %315 : vector<2x128xf32>
    %317 = math.tanh %311 : vector<2x128xf32>
    %318 = vector.extract_strided_slice %316 {offsets = [0, 0], sizes = [2, 32], strides = [1, 1]} : vector<2x128xf32> to vector<2x32xf32>
    %319 = vector.extract_strided_slice %316 {offsets = [0, 32], sizes = [2, 32], strides = [1, 1]} : vector<2x128xf32> to vector<2x32xf32>
    %320 = vector.extract_strided_slice %317 {offsets = [0, 64], sizes = [2, 32], strides = [1, 1]} : vector<2x128xf32> to vector<2x32xf32>
    %321 = vector.extract_strided_slice %316 {offsets = [0, 96], sizes = [2, 32], strides = [1, 1]} : vector<2x128xf32> to vector<2x32xf32>
    %322 = arith.mulf %319, %300 : vector<2x32xf32>
    %323 = arith.mulf %318, %320 : vector<2x32xf32>
    %324 = arith.addf %322, %323 : vector<2x32xf32>
    %325 = math.tanh %324 : vector<2x32xf32>
    %326 = arith.mulf %321, %325 : vector<2x32xf32>
    %c2_i32_127 = arith.constant 2 : i32
    %327 = arith.muli %c4_i32_120, %c2_i32_127 : i32
    %328 = arith.index_cast %327 : i32 to index
    %c0_128 = arith.constant 0 : index
    %329 = vector.load %arg14[%328, %c0_128] : memref<12x32xf32, #tpu.memory_space<vmem>>, vector<2x32xf32>
    tpu.vector_store %arg14[%328, %c0_128], %326 {strides = array<i32>} : memref<12x32xf32, #tpu.memory_space<vmem>>, vector<2x32xf32>,
    %c5_i32_129 = arith.constant 5 : i32
    %c2_i32_130 = arith.constant 2 : i32
    %330 = arith.muli %c5_i32_129, %c2_i32_130 : i32
    %331 = arith.index_cast %330 : i32 to index
    %c0_131 = arith.constant 0 : index
    %332 = vector.load %arg12[%331, %c0_131] : memref<12x128xf32, #tpu.memory_space<vmem>>, vector<2x128xf32>
    %c0_132 = arith.constant 0 : index
    %c0_133 = arith.constant 0 : index
    %333 = vector.load %arg7[%c0_132, %c0_133] : memref<32x128xf32, #tpu.memory_space<vmem>>, vector<32x128xf32>
    %cst_134 = arith.constant dense<0.000000e+00> : vector<2x128xf32>
    %334 = tpu.matmul %326, %333, %cst_134 {dimension_numbers = #tpu.dot_dimension_numbers<[1], [0], [0], [1], [0, 0, 1, 1], [], []>} : vector<2x32xf32>, vector<32x128xf32>, vector<2x128xf32> -> vector<2x128xf32>
    %335 = arith.addf %332, %334 : vector<2x128xf32>
    %336 = arith.negf %335 : vector<2x128xf32>
    %337 = math.exp %336 : vector<2x128xf32>
    %cst_135 = arith.constant 1.000000e+00 : f32
    %338 = vector.broadcast %cst_135 : f32 to vector<2x128xf32>
    %339 = arith.addf %338, %337 : vector<2x128xf32>
    %340 = arith.divf %338, %339 : vector<2x128xf32>
    %341 = math.tanh %335 : vector<2x128xf32>
    %342 = vector.extract_strided_slice %340 {offsets = [0, 0], sizes = [2, 32], strides = [1, 1]} : vector<2x128xf32> to vector<2x32xf32>
    %343 = vector.extract_strided_slice %340 {offsets = [0, 32], sizes = [2, 32], strides = [1, 1]} : vector<2x128xf32> to vector<2x32xf32>
    %344 = vector.extract_strided_slice %341 {offsets = [0, 64], sizes = [2, 32], strides = [1, 1]} : vector<2x128xf32> to vector<2x32xf32>
    %345 = vector.extract_strided_slice %340 {offsets = [0, 96], sizes = [2, 32], strides = [1, 1]} : vector<2x128xf32> to vector<2x32xf32>
    %346 = arith.mulf %343, %324 : vector<2x32xf32>
    %347 = arith.mulf %342, %344 : vector<2x32xf32>
    %348 = arith.addf %346, %347 : vector<2x32xf32>
    %349 = math.tanh %348 : vector<2x32xf32>
    %350 = arith.mulf %345, %349 : vector<2x32xf32>
    %c2_i32_136 = arith.constant 2 : i32
    %351 = arith.muli %c5_i32_129, %c2_i32_136 : i32
    %352 = arith.index_cast %351 : i32 to index
    %c0_137 = arith.constant 0 : index
    %353 = vector.load %arg14[%352, %c0_137] : memref<12x32xf32, #tpu.memory_space<vmem>>, vector<2x32xf32>
    tpu.vector_store %arg14[%352, %c0_137], %350 {strides = array<i32>} : memref<12x32xf32, #tpu.memory_space<vmem>>, vector<2x32xf32>,
    %c6_i32_138 = arith.constant 6 : i32
    %c0_139 = arith.constant 0 : index
    %c0_140 = arith.constant 0 : index
    %354 = tpu.strided_load %arg13[%c0_139, %c0_140] {strides = array<i32: 2, 1>} : memref<16x32xf32, #tpu.memory_space<vmem>>, vector<8x32xf32>
    %c0_141 = arith.constant 0 : index
    %c0_142 = arith.constant 0 : index
    %355 = tpu.strided_load %arg14[%c0_141, %c0_142] {strides = array<i32: 2, 1>} : memref<12x32xf32, #tpu.memory_space<vmem>>, vector<6x32xf32>
    %cst_143 = arith.constant dense<0.000000e+00> : vector<6x8xf32>
    %356 = tpu.matmul %355, %354, %cst_143 {dimension_numbers = #tpu.dot_dimension_numbers<[1], [1], [0], [0], [0, 0, 1, 0], [], []>} : vector<6x32xf32>, vector<8x32xf32>, vector<6x8xf32> -> vector<6x8xf32>
    %cst_144 = arith.constant dense<0xFF800000> : vector<6xf32>
    %357 = vector.multi_reduction <maximumf>, %356, %cst_144 [1] : vector<6x8xf32> to vector<6xf32>
    %358 = vector.shape_cast %357 : vector<6xf32> to vector<6x1xf32>
    %359 = vector.broadcast %358 : vector<6x1xf32> to vector<6x8xf32>
    %360 = arith.subf %356, %359 : vector<6x8xf32>
    %361 = math.exp %360 : vector<6x8xf32>
    %cst_145 = arith.constant dense<0.000000e+00> : vector<6xf32>
    %362 = vector.multi_reduction <add>, %361, %cst_145 [1] : vector<6x8xf32> to vector<6xf32>
    %363 = vector.shape_cast %362 : vector<6xf32> to vector<6x1xf32>
    %364 = tpu.reciprocal %363 {approx = true} : vector<6x1xf32> -> vector<6x1xf32>
    %365 = arith.mulf %363, %364 : vector<6x1xf32>
    %cst_146 = arith.constant 2.000000e+00 : f32
    %366 = vector.broadcast %cst_146 : f32 to vector<6x1xf32>
    %367 = arith.subf %366, %365 : vector<6x1xf32>
    %368 = arith.mulf %364, %367 : vector<6x1xf32>
    %369 = vector.broadcast %368 : vector<6x1xf32> to vector<6x8xf32>
    %370 = arith.mulf %361, %369 : vector<6x8xf32>
    %cst_147 = arith.constant dense<0.000000e+00> : vector<6x32xf32>
    %371 = tpu.matmul %370, %354, %cst_147 {dimension_numbers = #tpu.dot_dimension_numbers<[1], [0], [0], [1], [0, 0, 1, 1], [], []>} : vector<6x8xf32>, vector<8x32xf32>, vector<6x32xf32> -> vector<6x32xf32>
    %cst_148 = arith.constant 0.000000e+00 : f32
    %372 = vector.broadcast %cst_148 : f32 to vector<6x64xf32>
    %373 = tpu.concatenate %355, %371, %372 in 1 : vector<6x32xf32>, vector<6x32xf32>, vector<6x64xf32> -> vector<6x128xf32>
    %c0_149 = arith.constant 0 : index
    %c0_150 = arith.constant 0 : index
    %c0_151 = arith.constant 0 : index
    %374 = vector.load %arg9[%c0_149, %c0_150, %c0_151] : memref<2x6x128xf32, #tpu.memory_space<vmem>>, vector<1x6x128xf32>
    %375 = vector.shape_cast %374 : vector<1x6x128xf32> to vector<6x128xf32>
    %376 = vector.shape_cast %373 : vector<6x128xf32> to vector<1x6x128xf32>
    tpu.vector_store %arg9[%c0_149, %c0_150, %c0_151], %376 {strides = array<i32>} : memref<2x6x128xf32, #tpu.memory_space<vmem>>, vector<1x6x128xf32>,
    %cst_152 = arith.constant 0.000000e+00 : f32
    %377 = vector.broadcast %cst_152 : f32 to vector<6x120xf32>
    %378 = tpu.concatenate %370, %377 in 1 : vector<6x8xf32>, vector<6x120xf32> -> vector<6x128xf32>
    %c0_153 = arith.constant 0 : index
    %c0_154 = arith.constant 0 : index
    %c0_155 = arith.constant 0 : index
    %379 = vector.load %arg10[%c0_153, %c0_154, %c0_155] : memref<2x6x128xf32, #tpu.memory_space<vmem>>, vector<1x6x128xf32>
    %380 = vector.shape_cast %379 : vector<1x6x128xf32> to vector<6x128xf32>
    %381 = vector.shape_cast %378 : vector<6x128xf32> to vector<1x6x128xf32>
    tpu.vector_store %arg10[%c0_153, %c0_154, %c0_155], %381 {strides = array<i32>} : memref<2x6x128xf32, #tpu.memory_space<vmem>>, vector<1x6x128xf32>,
    %c1 = arith.constant 1 : index
    %c0_156 = arith.constant 0 : index
    %382 = tpu.strided_load %arg13[%c1, %c0_156] {strides = array<i32: 2, 1>} : memref<16x32xf32, #tpu.memory_space<vmem>>, vector<8x32xf32>
    %c1_157 = arith.constant 1 : index
    %c0_158 = arith.constant 0 : index
    %383 = tpu.strided_load %arg14[%c1_157, %c0_158] {strides = array<i32: 2, 1>} : memref<12x32xf32, #tpu.memory_space<vmem>>, vector<6x32xf32>
    %cst_159 = arith.constant dense<0.000000e+00> : vector<6x8xf32>
    %384 = tpu.matmul %383, %382, %cst_159 {dimension_numbers = #tpu.dot_dimension_numbers<[1], [1], [0], [0], [0, 0, 1, 0], [], []>} : vector<6x32xf32>, vector<8x32xf32>, vector<6x8xf32> -> vector<6x8xf32>
    %cst_160 = arith.constant dense<0xFF800000> : vector<6xf32>
    %385 = vector.multi_reduction <maximumf>, %384, %cst_160 [1] : vector<6x8xf32> to vector<6xf32>
    %386 = vector.shape_cast %385 : vector<6xf32> to vector<6x1xf32>
    %387 = vector.broadcast %386 : vector<6x1xf32> to vector<6x8xf32>
    %388 = arith.subf %384, %387 : vector<6x8xf32>
    %389 = math.exp %388 : vector<6x8xf32>
    %cst_161 = arith.constant dense<0.000000e+00> : vector<6xf32>
    %390 = vector.multi_reduction <add>, %389, %cst_161 [1] : vector<6x8xf32> to vector<6xf32>
    %391 = vector.shape_cast %390 : vector<6xf32> to vector<6x1xf32>
    %392 = tpu.reciprocal %391 {approx = true} : vector<6x1xf32> -> vector<6x1xf32>
    %393 = arith.mulf %391, %392 : vector<6x1xf32>
    %cst_162 = arith.constant 2.000000e+00 : f32
    %394 = vector.broadcast %cst_162 : f32 to vector<6x1xf32>
    %395 = arith.subf %394, %393 : vector<6x1xf32>
    %396 = arith.mulf %392, %395 : vector<6x1xf32>
    %397 = vector.broadcast %396 : vector<6x1xf32> to vector<6x8xf32>
    %398 = arith.mulf %389, %397 : vector<6x8xf32>
    %cst_163 = arith.constant dense<0.000000e+00> : vector<6x32xf32>
    %399 = tpu.matmul %398, %382, %cst_163 {dimension_numbers = #tpu.dot_dimension_numbers<[1], [0], [0], [1], [0, 0, 1, 1], [], []>} : vector<6x8xf32>, vector<8x32xf32>, vector<6x32xf32> -> vector<6x32xf32>
    %cst_164 = arith.constant 0.000000e+00 : f32
    %400 = vector.broadcast %cst_164 : f32 to vector<6x64xf32>
    %401 = tpu.concatenate %383, %399, %400 in 1 : vector<6x32xf32>, vector<6x32xf32>, vector<6x64xf32> -> vector<6x128xf32>
    %c1_165 = arith.constant 1 : index
    %c0_166 = arith.constant 0 : index
    %c0_167 = arith.constant 0 : index
    %402 = vector.load %arg9[%c1_165, %c0_166, %c0_167] : memref<2x6x128xf32, #tpu.memory_space<vmem>>, vector<1x6x128xf32>
    %403 = vector.shape_cast %402 : vector<1x6x128xf32> to vector<6x128xf32>
    %404 = vector.shape_cast %401 : vector<6x128xf32> to vector<1x6x128xf32>
    tpu.vector_store %arg9[%c1_165, %c0_166, %c0_167], %404 {strides = array<i32>} : memref<2x6x128xf32, #tpu.memory_space<vmem>>, vector<1x6x128xf32>,
    %cst_168 = arith.constant 0.000000e+00 : f32
    %405 = vector.broadcast %cst_168 : f32 to vector<6x120xf32>
    %406 = tpu.concatenate %398, %405 in 1 : vector<6x8xf32>, vector<6x120xf32> -> vector<6x128xf32>
    %c1_169 = arith.constant 1 : index
    %c0_170 = arith.constant 0 : index
    %c0_171 = arith.constant 0 : index
    %407 = vector.load %arg10[%c1_169, %c0_170, %c0_171] : memref<2x6x128xf32, #tpu.memory_space<vmem>>, vector<1x6x128xf32>
    %408 = vector.shape_cast %407 : vector<1x6x128xf32> to vector<6x128xf32>
    %409 = vector.shape_cast %406 : vector<6x128xf32> to vector<1x6x128xf32>
    tpu.vector_store %arg10[%c1_169, %c0_170, %c0_171], %409 {strides = array<i32>} : memref<2x6x128xf32, #tpu.memory_space<vmem>>, vector<1x6x128xf32>,
    return
  }
  func.func @transform_0(%arg0: i32) -> (i32, i32, i32) {
    %c0_i32 = arith.constant 0 : i32
    %c0_i32_0 = arith.constant 0 : i32
    %c0_i32_1 = arith.constant 0 : i32
    return %arg0, %c0_i32, %c0_i32_0 : i32, i32, i32
  }
  func.func @transform_1(%arg0: i32) -> (i32, i32, i32) {
    %c0_i32 = arith.constant 0 : i32
    %c0_i32_0 = arith.constant 0 : i32
    %c0_i32_1 = arith.constant 0 : i32
    return %arg0, %c0_i32, %c0_i32_0 : i32, i32, i32
  }
  func.func @transform_2(%arg0: i32) -> (i32, i32) {
    %c0_i32 = arith.constant 0 : i32
    %c0_i32_0 = arith.constant 0 : i32
    %c0_i32_1 = arith.constant 0 : i32
    return %c0_i32, %c0_i32_0 : i32, i32
  }
  func.func @transform_3(%arg0: i32) -> (i32, i32) {
    %c0_i32 = arith.constant 0 : i32
    %c0_i32_0 = arith.constant 0 : i32
    %c0_i32_1 = arith.constant 0 : i32
    return %c0_i32, %c0_i32_0 : i32, i32
  }
  func.func @transform_4(%arg0: i32) -> (i32, i32) {
    %c0_i32 = arith.constant 0 : i32
    %c0_i32_0 = arith.constant 0 : i32
    %c0_i32_1 = arith.constant 0 : i32
    return %c0_i32, %c0_i32_0 : i32, i32
  }
  func.func @transform_5(%arg0: i32) -> (i32, i32) {
    %c0_i32 = arith.constant 0 : i32
    %c0_i32_0 = arith.constant 0 : i32
    %c0_i32_1 = arith.constant 0 : i32
    return %c0_i32, %c0_i32_0 : i32, i32
  }
  func.func @transform_6(%arg0: i32) -> (i32, i32) {
    %c0_i32 = arith.constant 0 : i32
    %c0_i32_0 = arith.constant 0 : i32
    %c0_i32_1 = arith.constant 0 : i32
    return %c0_i32, %c0_i32_0 : i32, i32
  }
  func.func @transform_7(%arg0: i32) -> (i32, i32) {
    %c0_i32 = arith.constant 0 : i32
    %c0_i32_0 = arith.constant 0 : i32
    %c0_i32_1 = arith.constant 0 : i32
    return %c0_i32, %c0_i32_0 : i32, i32
  }
  func.func @transform_8(%arg0: i32) -> (i32, i32, i32) {
    %c0_i32 = arith.constant 0 : i32
    %c0_i32_0 = arith.constant 0 : i32
    %c0_i32_1 = arith.constant 0 : i32
    return %arg0, %c0_i32, %c0_i32_0 : i32, i32, i32
  }
  func.func @transform_9(%arg0: i32) -> (i32, i32, i32) {
    %c0_i32 = arith.constant 0 : i32
    %c0_i32_0 = arith.constant 0 : i32
    %c0_i32_1 = arith.constant 0 : i32
    return %arg0, %c0_i32, %c0_i32_0 : i32, i32, i32
  }
}

</mosaic_0001>

<bundles_post_ra>
// kernel: tpu_custom_call.1
= control target key start
LH: loop header
LB: loop body
LE: loop exit
PB: predicated region body
PF: predicated region fallthrough
CT: control target
= control target key end

     0   :  { %15 = vsyncpa [#allocation7], 0  ;;  %s3065_s0 = inlined_call_operand.hbm [shape: f32[1,16,16], index: 0, kind: input, shape index: {}]   ;;  %s3066_s1 = inlined_call_operand.vmem [shape: f32[1,12,16], index: 1, kind: input, shape index: {}]   ;;  %s3067_s2 = inlined_call_operand.hbm [shape: f32[16,128], index: 2, kind: input, shape index: {}]   ;;  %s3068_s3 = inlined_call_operand.vmem [shape: f32[32,128], index: 3, kind: input, shape index: {}]   ;;  %s3069_s4 = inlined_call_operand.vmem [shape: f32[1,128], index: 4, kind: input, shape index: {}]   ;;  %s3070_s5 = inlined_call_operand.hbm [shape: f32[16,128], index: 5, kind: input, shape index: {}]   ;;  %s3071_s6 = inlined_call_operand.hbm [shape: f32[32,128], index: 6, kind: input, shape index: {}]   ;;  %s3072_s7 = inlined_call_operand.vmem [shape: f32[1,128], index: 7, kind: input, shape index: {}]   ;;  %s3073_s8 = inlined_call_operand.vmem [shape: f32[2,6,128], index: 8, kind: output, shape index: {0}]   ;;  %s3074_s9 = inlined_call_operand.vmem [shape: f32[2,6,128], index: 9, kind: output, shape index: {1}]  }
   0x1   :  { %16 = vsyncpa [#allocation9], 0 }
   0x2   :  { %17 = vsyncpa [#allocation12], 0  ;;  %s2673_s30 = smov [#allocation8]   ;;  %s2674_s11 = smov [#allocation6]  }
   0x3   :  { %s37_s10 = sshll.u32 %s2673_s30, 4  ;;  %s23_s12 = sshll.u32 %s2674_s11, 4  ;;  %s38_s10 = int_to_ptr.vmem [resolvable:$true] %s37_s10  ;;  %s24_s12 = int_to_ptr.vmem [resolvable:$true] %s23_s12 }
   0x4   :  { %s2595_s13 = scalar_lea.vmem %s38_s10, 256  ;;  %p2600_p1 = scmp.lt.s32.totalorder %s38_s10, %s38_s10 }
   0x5   :  { %p2596_p0 = scmp.ne.s32.totalorder %s38_s10, %s2595_s13  ;;  %p2601_p2 = scmp.lt.s32.totalorder %s2595_s13, %s2595_s13 }
   0x7   :  { %p2602_p3 = por %p2601_p2, %p2600_p1 }
   0x9   :  { %p2603_p4 = pnand %p2602_p3, %p2596_p0 }
   0xb   :  { %2606 = shalt.err (!%p2603_p4)
}
   0xc   :  { %s2675_s14 = smov 128   ;;  %s2676_s15 = smov 8  }
   0xd   :  { %43 = dma.hbm_to_vmem [thread:$0]  %s3067_s2, 256, %s38_s10, [#allocation9], %s2675_s14, %s2675_s14, %s2676_s15  }
   0xe   :  { %s2615_s18 = scalar_lea.vmem %s24_s12, 256  ;;  %p2620_p6 = scmp.lt.s32.totalorder %s24_s12, %s24_s12 }
   0xf   :  { %p2616_p5 = scmp.ne.s32.totalorder %s24_s12, %s2615_s18  ;;  %p2621_p7 = scmp.lt.s32.totalorder %s2615_s18, %s2615_s18 }
  0x11   :  { %p2622_p8 = por %p2621_p7, %p2620_p6 }
  0x13   :  { %p2623_p9 = pnand %p2622_p8, %p2616_p5 }
  0x15   :  { %2626 = shalt.err (!%p2623_p9)
}
  0x16   :  { %29 = dma.hbm_to_vmem [thread:$0]  %s3065_s0, 256, %s24_s12, [#allocation7], %s2675_s14, %s2675_s14, %s2676_s15  }
  0x17   :  { %s2677_s21 = smov [#allocation10]   ;;  %s2678_s23 = smov [#allocation11]  }
  0x18   :  { %s53_s22 = sshll.u32 %s2677_s21, 4  ;;  %s65_s24 = sshll.u32 %s2678_s23, 4  ;;  %s54_s22 = int_to_ptr.vmem [resolvable:$true] %s53_s22  ;;  %s66_s24 = int_to_ptr.vmem [resolvable:$true] %s65_s24 }
  0x19   :  { %s2635_s2 = scalar_lea.vmem %s54_s22, 256  ;;  %p2640_p11 = scmp.lt.s32.totalorder %s54_s22, %s54_s22 }
  0x1a   :  { %p2636_p10 = scmp.ne.s32.totalorder %s54_s22, %s2635_s2  ;;  %p2641_p12 = scmp.lt.s32.totalorder %s2635_s2, %s2635_s2 }
  0x1c   :  { %p2642_p13 = por %p2641_p12, %p2640_p11 }
  0x1e   :  { %p2643_p0 = pnand %p2642_p13, %p2636_p10 }
  0x20   :  { %2646 = shalt.err (!%p2643_p0)
}
  0x21   :  { %59 = dma.hbm_to_vmem [thread:$0]  %s3070_s5, 256, %s54_s22, [#allocation9], %s2675_s14, %s2675_s14, %s2676_s15  }
  0x22   :  { %s2655_s0 = scalar_lea.vmem %s66_s24, 512  ;;  %p2660_p2 = scmp.lt.s32.totalorder %s66_s24, %s66_s24 }
  0x23   :  { %p2656_p1 = scmp.ne.s32.totalorder %s66_s24, %s2655_s0  ;;  %p2661_p3 = scmp.lt.s32.totalorder %s2655_s0, %s2655_s0 }
  0x25   :  { %p2662_p4 = por %p2661_p3, %p2660_p2 }
  0x27   :  { %p2663_p5 = pnand %p2662_p4, %p2656_p1 }
  0x29   :  { %2666 = shalt.err (!%p2663_p5)
}
  0x2a   :  { %71 = dma.hbm_to_vmem [thread:$0]  %s3071_s6, 512, %s66_s24, [#allocation12], %s2675_s14, %s2675_s14, %s2676_s15  }
  0x2b   :  { %2667 = dma.done.wait [#allocation7], 256  }
  0x2c   :  { %2668 = vsyncadd [#allocation7], 4294967040 }
  0x2d   :  { %2669 = dma.done.wait [#allocation9], 512  }
  0x2e   :  { %2670 = vsyncadd [#allocation9], 4294966784 }
  0x2f   :  { %2671 = dma.done.wait [#allocation12], 512  }
  0x30   :  { %2672 = vsyncadd [#allocation12], 4294966784  ;;  %vm97_vm0 = vcmask 130048   ;;  %v89_v0 = vld [vmem:[#allocation8 + $0x8] sm:$0xff]  ;;  %v88_v1 = vld [vmem:[#allocation8] sm:$0xff]  ;;  %v2679_v5 = vmov 0.0  }
  0x31   :  { %v86_v2 = vld [vmem:[#allocation6] sm:$0xff]  ;;  %2269 = vmatprep.subr.mxu0 %v89_v0  ;;  %v87_v3 = vld [vmem:[#allocation6 + $0x8] sm:$0xff]  ;;  %v2761_v4 = vld [vmem:[%s3068_s3 + $0x18] sm:$0xff]  ;;  %vm2680_vm1 = vmmov 0   ;;  %s2681_s15 = smov 64   ;;  %vm383_vm2 = vcmask 254976  }
  0x32   :  { %2273 = vmatprep.mubr.msk.f32.mxu0 %vm97_vm0, %v86_v2  ;;  %2270 = vmatpush3.msra.mxu0 %v89_v0  ;;  %v2768_v6 = vld [vmem:[%s3068_s3 + $0x10] sm:$0xff]  ;;  %v2777_v7 = vld [vmem:[%s3068_s3 + $0x8] sm:$0xff]  ;;  %v2784_v8 = vld [vmem:[%s3068_s3] sm:$0xff]  ;;  %vm280_vm3 = vcmask 261120   ;;  %vm1854_vm4 = vcmask 62464   ;;  %vm1869_vm5 = vcmask 64512  }
  0x33   :  { %2271 = vmatprep.subr.mxu0 %v88_v1  ;;  %v2142_v9 = vld [vmem:[%s3069_s4] ss:$0 sm:$0xff]  ;;  %s2682_s4 = smov 32   ;;  %v184_v28 = vld [vmem:[#allocation10 + $0x8] sm:$0xff]  ;;  %vm1948_vm6 = vcmask 523264  }
  0x34   :  { %2272 = vmatpush3.msra.mxu0 %v88_v1  ;;  %v183_v29 = vld [vmem:[#allocation10] sm:$0xff]  ;;  %2276 = vmatprep.subr.mxu1 %v184_v28  ;;  %v182_v31 = vld [vmem:[%s3066_s1 + $0x8] sm:$0xf] }
  0x35   :  { %2274 = vmatmul.mubr.msk.f32.vlgmr.msra.gmra.mxu0 %vm97_vm0, %v87_v3  ;;  %2283 = vmatprep.subr.mxu0 %v2679_v5  ;;  %v181_v30 = vld [vmem:[%s3066_s1] sm:$0xff] }
  0x36   :  { %2284 = vmatpush3.msra.mxu0 %v2761_v4  ;;  %2291 = vmatprep.mubr.msk.f32.mxu0 %vm2680_vm1, %v2679_v5  ;;  %v2145_v35 = vld [vmem:[%s3072_s7] ss:$0 sm:$0xff] }
  0x37   :  { %2285 = vmatprep.subr.mxu0 %v2679_v5  ;;  %2280 = vmatprep.mubr.msk.f32.mxu1 %vm97_vm0, %v181_v30 }
  0x38   :  { %2286 = vmatpush3.msra.mxu0 %v2768_v6  ;;  %2277 = vmatpush3.msra.mxu1 %v184_v28 }
  0x39   :  { %2287 = vmatprep.subr.mxu0 %v2679_v5  ;;  %2278 = vmatprep.subr.mxu1 %v183_v29 }
  0x3a   :  { %2288 = vmatpush3.msra.mxu0 %v2777_v7  ;;  %2279 = vmatpush3.msra.mxu1 %v183_v29 }
  0x3b   :  { %2289 = vmatprep.subr.mxu0 %v2679_v5  ;;  %2281 = vmatmul.mubr.msk.f32.vlgmr.msra.gmra.mxu1 %vm97_vm0, %v182_v31 }
  0x3c   :  { %2290 = vmatpush3.msra.mxu0 %v2784_v8  ;;  %2294 = vmatprep.subr.mxu1 %v2679_v5 }
  0x3d   :  { %2292 = vmatmul.mubr.f32.vlgmr.msra.gmra.mxu0 %v2679_v5  ;;  %2305 = vmatprep.subr.mxu0 %v2679_v5 }
  0x3e   :  { %2306 = vmatpush3.msra.mxu0 %v2761_v4  ;;  %2313 = vmatprep.mubr.msk.f32.mxu0 %vm2680_vm1, %v2679_v5 }
  0x3f   :  { %2307 = vmatprep.subr.mxu0 %v2679_v5  ;;  %2295 = vmatpush3.msra.mxu1 %v2761_v4 }
  0x40   :  { %2308 = vmatpush3.msra.mxu0 %v2768_v6  ;;  %2302 = vmatprep.mubr.msk.f32.mxu1 %vm2680_vm1, %v2679_v5 }
  0x41   :  { %2309 = vmatprep.subr.mxu0 %v2679_v5  ;;  %2296 = vmatprep.subr.mxu1 %v2679_v5 }
  0x42   :  { %2310 = vmatpush3.msra.mxu0 %v2777_v7  ;;  %2297 = vmatpush3.msra.mxu1 %v2768_v6 }
  0x43   :  { %2311 = vmatprep.subr.mxu0 %v2679_v5  ;;  %2298 = vmatprep.subr.mxu1 %v2679_v5 }
  0x44   :  { %2312 = vmatpush3.msra.mxu0 %v2784_v8  ;;  %2299 = vmatpush3.msra.mxu1 %v2777_v7 }
  0x45   :  { %2327 = vmatprep.subr.mxu0 %v2679_v5  ;;  %2300 = vmatprep.subr.mxu1 %v2679_v5 }
  0x46   :  { %2301 = vmatpush3.msra.mxu1 %v2784_v8 }
  0x47   :  { %2316 = vmatprep.subr.mxu1 %v2679_v5 }
  0xf5   :  { %v2275_v10 = vpop.f32.mrf.mxu0 }
  0xf6   :  { %v176_v11 = vadd.f32 %v2275_v10, %v2142_v9 }
  0xf7   :  { %v170_v12 = vpop.f32.mrf.mxu0 }
  0xf8   :  { %180 = vst [vmem:[#allocation2 + $0x8] sm:$0xff] %v176_v11  ;;  %v171_v13 = vadd.f32 %v2142_v9, %v170_v12 }
  0xfa   :  { %179 = vst [vmem:[#allocation2] sm:$0xff] %v171_v13 }
  0xfb   :  { %v2282_v36 = vpop.f32.mrf.mxu1 }
  0xfc   :  { %v270_v37 = vadd.f32 %v2282_v36, %v2145_v35 }
  0xfd   :  { %v350_v14 = vpop.f32.mrf.mxu0  ;;  %v264_v38 = vpop.f32.mrf.mxu1 }
  0xfe   :  { %274 = vst [vmem:[#allocation3 + $0x8] sm:$0xf] %v270_v37  ;;  %v265_v39 = vadd.f32 %v2145_v35, %v264_v38 }
  0xff   :  { %v2293_v15 = vpop.f32.mrf.mxu0  ;;  %v706_v36 = vld [vmem:[#allocation2 + $0x8] sm:$0x3] }
 0x100   :  { %273 = vst [vmem:[#allocation3] sm:$0xff] %v265_v39 }
 0x101   :  { %v275_v16 = vld [vmem:[#allocation2] sm:$0x3]  ;;  %v385_v41 = vld [vmem:[#allocation2 + $0x2] sm:$0x3]  ;;  %v492_v59 = vld [vmem:[#allocation2 + $0x4] sm:$0x3] }
 0x102   :  { %v354_v17 = vadd.f32 %v350_v14, %v275_v16 }
 0x104   :  { %2467 = vtanh.f32 %v354_v17  ;;  %v2148_v19 = vmul.f32 -1.442695, %v354_v17 }
 0x106   :  { %2469 = vpow2.f32 %v2148_v19 }
 0x111   :  { %v2468_v18 = vpop.eup %2467 }
 0x112   :  { %364 = vrot.lane.b32.xlu0 %v2468_v18, %s2681_s15  ;;  %v599_v18 = vld [vmem:[#allocation2 + $0x6] sm:$0x3] }
 0x113   :  { %v2470_v20 = vpop.eup %2469 }
 0x114   :  { %v358_v21 = vadd.f32 1.0, %v2470_v20 }
 0x116   :  { %2471 = vrcp.f32 %v358_v21 }
 0x123   :  { %v2472_v22 = vpop.eup %2471 }
 0x124   :  { %v362_v25 = vmul.f32 0.0, %v2472_v22 }
 0x184   :  { %v365_v23 = vpop.permute.xlu0 %364 }
 0x185   :  { %v367_v24 = vmul.f32 %v2472_v22, %v365_v23 }
 0x187   :  { %369 = vrot.lane.b32.xlu0 %v367_v24, %s2682_s4 }
 0x1f9   :  { %v370_v26 = vpop.permute.xlu0 %369 }
 0x1fa   :  { %v2806_v27 = vadd.f32 %v370_v26, %v362_v25 }
 0x1fc   :  { %2473 = vtanh.f32 %v2806_v27 }
 0x209   :  { %v2474_v32 = vpop.eup %2473 }
 0x20a   :  { %375 = vrot.lane.b32.xlu1 %v2474_v32, %s2681_s15 }
 0x27c   :  { %v376_v33 = vpop.permute.xlu1 %375 }
 0x27d   :  { %v378_v34 = vmul.f32 %v2472_v22, %v376_v33 }
 0x27f   :  { %380 = vrot.lane.b32.xlu1 %v378_v34, %s2682_s4 }
 0x2f1   :  { %v381_v40 = vpop.permute.xlu1 %380 }
 0x2f2   :  { %384 = vst.msk [vmem:[#allocation4] sm:$0x3] %vm383_vm2, %v381_v40  ;;  %2303 = vmatmul.mubr.msk.f32.vlgmr.msra.gmra.mxu1 %vm280_vm3, %v381_v40 }
 0x2f3   :  { %2317 = vmatpush3.msra.mxu1 %v2761_v4  ;;  %2324 = vmatprep.mubr.msk.f32.mxu1 %vm2680_vm1, %v2679_v5 }
 0x2f4   :  { %2318 = vmatprep.subr.mxu1 %v2679_v5 }
 0x2f5   :  { %2319 = vmatpush3.msra.mxu1 %v2768_v6 }
 0x2f6   :  { %2320 = vmatprep.subr.mxu1 %v2679_v5 }
 0x2f7   :  { %2321 = vmatpush3.msra.mxu1 %v2777_v7 }
 0x2f8   :  { %2322 = vmatprep.subr.mxu1 %v2679_v5 }
 0x2f9   :  { %2323 = vmatpush3.msra.mxu1 %v2784_v8 }
 0x2fa   :  { %2338 = vmatprep.subr.mxu1 %v2679_v5 }
 0x3b2   :  { %v458_v42 = vpop.f32.mrf.mxu1 }
 0x3b3   :  { %v462_v43 = vadd.f32 %v458_v42, %v385_v41 }
 0x3b4   :  { %v2304_v44 = vpop.f32.mrf.mxu1 }
 0x3b5   :  { %2475 = vtanh.f32 %v462_v43  ;;  %v2150_v46 = vmul.f32 -1.442695, %v462_v43 }
 0x3b7   :  { %2477 = vpow2.f32 %v2150_v46 }
 0x3c2   :  { %v2476_v45 = vpop.eup %2475 }
 0x3c3   :  { %472 = vrot.lane.b32.xlu0 %v2476_v45, %s2681_s15 }
 0x3c4   :  { %v2478_v47 = vpop.eup %2477 }
 0x3c5   :  { %v466_v48 = vadd.f32 1.0, %v2478_v47 }
 0x3c7   :  { %2479 = vrcp.f32 %v466_v48 }
 0x3d4   :  { %v2480_v49 = vpop.eup %2479 }
 0x3d5   :  { %v470_v52 = vmul.f32 %v2480_v49, %v2806_v27 }
 0x435   :  { %v473_v50 = vpop.permute.xlu0 %472 }
 0x436   :  { %v475_v51 = vmul.f32 %v2480_v49, %v473_v50 }
 0x438   :  { %477 = vrot.lane.b32.xlu1 %v475_v51, %s2682_s4 }
 0x4aa   :  { %v478_v53 = vpop.permute.xlu1 %477 }
 0x4ab   :  { %v480_v54 = vadd.f32 %v478_v53, %v470_v52 }
 0x4ad   :  { %2481 = vtanh.f32 %v480_v54 }
 0x4ba   :  { %v2482_v55 = vpop.eup %2481 }
 0x4bb   :  { %483 = vrot.lane.b32.xlu0 %v2482_v55, %s2681_s15 }
 0x52d   :  { %v484_v56 = vpop.permute.xlu0 %483 }
 0x52e   :  { %v486_v57 = vmul.f32 %v2480_v49, %v484_v56 }
 0x530   :  { %488 = vrot.lane.b32.xlu1 %v486_v57, %s2682_s4 }
 0x5a2   :  { %v489_v58 = vpop.permute.xlu1 %488 }
 0x5a3   :  { %491 = vst.msk [vmem:[#allocation4 + $0x2] sm:$0x3] %vm383_vm2, %v489_v58  ;;  %2314 = vmatmul.mubr.msk.f32.vlgmr.msra.gmra.mxu0 %vm280_vm3, %v489_v58 }
 0x5a4   :  { %2328 = vmatpush3.msra.mxu0 %v2761_v4  ;;  %2335 = vmatprep.mubr.msk.f32.mxu0 %vm2680_vm1, %v2679_v5 }
 0x5a5   :  { %2329 = vmatprep.subr.mxu0 %v2679_v5 }
 0x5a6   :  { %2330 = vmatpush3.msra.mxu0 %v2768_v6 }
 0x5a7   :  { %2331 = vmatprep.subr.mxu0 %v2679_v5 }
 0x5a8   :  { %2332 = vmatpush3.msra.mxu0 %v2777_v7 }
 0x5a9   :  { %2333 = vmatprep.subr.mxu0 %v2679_v5 }
 0x5aa   :  { %2334 = vmatpush3.msra.mxu0 %v2784_v8 }
 0x5ab   :  { %2349 = vmatprep.subr.mxu0 %v2679_v5 }
 0x663   :  { %v565_v60 = vpop.f32.mrf.mxu0 }
 0x664   :  { %v569_v61 = vadd.f32 %v565_v60, %v492_v59 }
 0x665   :  { %v2315_v62 = vpop.f32.mrf.mxu0 }
 0x666   :  { %2483 = vtanh.f32 %v569_v61  ;;  %v2152_v0 = vmul.f32 -1.442695, %v569_v61 }
 0x668   :  { %2485 = vpow2.f32 %v2152_v0 }
 0x673   :  { %v2484_v63 = vpop.eup %2483 }
 0x674   :  { %579 = vrot.lane.b32.xlu0 %v2484_v63, %s2681_s15 }
 0x675   :  { %v2486_v1 = vpop.eup %2485 }
 0x676   :  { %v573_v2 = vadd.f32 1.0, %v2486_v1 }
 0x678   :  { %2487 = vrcp.f32 %v573_v2 }
 0x685   :  { %v2488_v3 = vpop.eup %2487 }
 0x686   :  { %v577_v11 = vmul.f32 %v2488_v3, %v480_v54  ;;  %v813_v54 = vld [vmem:[#allocation2 + $0xa] sm:$0x3] }
 0x6e6   :  { %v580_v9 = vpop.permute.xlu0 %579 }
 0x6e7   :  { %v582_v10 = vmul.f32 %v2488_v3, %v580_v9  ;;  %v920_v9 = vld [vmem:[#allocation2 + $0xc] sm:$0x3] }
 0x6e9   :  { %584 = vrot.lane.b32.xlu1 %v582_v10, %s2682_s4 }
 0x75b   :  { %v585_v12 = vpop.permute.xlu1 %584 }
 0x75c   :  { %v587_v13 = vadd.f32 %v585_v12, %v577_v11 }
 0x75e   :  { %2489 = vtanh.f32 %v587_v13 }
 0x76b   :  { %v2490_v14 = vpop.eup %2489 }
 0x76c   :  { %590 = vrot.lane.b32.xlu0 %v2490_v14, %s2681_s15 }
 0x7de   :  { %v591_v15 = vpop.permute.xlu0 %590 }
 0x7df   :  { %v593_v16 = vmul.f32 %v2488_v3, %v591_v15 }
 0x7e1   :  { %595 = vrot.lane.b32.xlu1 %v593_v16, %s2682_s4 }
 0x853   :  { %v596_v17 = vpop.permute.xlu1 %595 }
 0x854   :  { %598 = vst.msk [vmem:[#allocation4 + $0x4] sm:$0x3] %vm383_vm2, %v596_v17  ;;  %2325 = vmatmul.mubr.msk.f32.vlgmr.msra.gmra.mxu1 %vm280_vm3, %v596_v17 }
 0x855   :  { %2339 = vmatpush3.msra.mxu1 %v2761_v4  ;;  %2346 = vmatprep.mubr.msk.f32.mxu1 %vm2680_vm1, %v2679_v5 }
 0x856   :  { %2340 = vmatprep.subr.mxu1 %v2679_v5 }
 0x857   :  { %2341 = vmatpush3.msra.mxu1 %v2768_v6 }
 0x858   :  { %2342 = vmatprep.subr.mxu1 %v2679_v5 }
 0x859   :  { %2343 = vmatpush3.msra.mxu1 %v2777_v7 }
 0x85a   :  { %2344 = vmatprep.subr.mxu1 %v2679_v5 }
 0x85b   :  { %2345 = vmatpush3.msra.mxu1 %v2784_v8 }
 0x85c   :  { %2360 = vmatprep.subr.mxu1 %v2679_v5 }
 0x914   :  { %v672_v19 = vpop.f32.mrf.mxu1 }
 0x915   :  { %v676_v20 = vadd.f32 %v672_v19, %v599_v18 }
 0x916   :  { %v2326_v21 = vpop.f32.mrf.mxu1 }
 0x917   :  { %2491 = vtanh.f32 %v676_v20  ;;  %v2154_v23 = vmul.f32 -1.442695, %v676_v20 }
 0x919   :  { %2493 = vpow2.f32 %v2154_v23 }
 0x924   :  { %v2492_v22 = vpop.eup %2491 }
 0x925   :  { %686 = vrot.lane.b32.xlu0 %v2492_v22, %s2681_s15 }
 0x926   :  { %v2494_v24 = vpop.eup %2493 }
 0x927   :  { %v680_v25 = vadd.f32 1.0, %v2494_v24 }
 0x929   :  { %2495 = vrcp.f32 %v680_v25 }
 0x936   :  { %v2496_v26 = vpop.eup %2495 }
 0x937   :  { %v684_v29 = vmul.f32 %v2496_v26, %v587_v13 }
 0x997   :  { %v687_v27 = vpop.permute.xlu0 %686 }
 0x998   :  { %v689_v28 = vmul.f32 %v2496_v26, %v687_v27  ;;  %v1027_v27 = vld [vmem:[#allocation2 + $0xe] sm:$0x3] }
 0x99a   :  { %691 = vrot.lane.b32.xlu1 %v689_v28, %s2682_s4 }
 0xa0c   :  { %v692_v30 = vpop.permute.xlu1 %691 }
 0xa0d   :  { %v694_v31 = vadd.f32 %v692_v30, %v684_v29 }
 0xa0f   :  { %2497 = vtanh.f32 %v694_v31 }
 0xa1c   :  { %v2498_v32 = vpop.eup %2497 }
 0xa1d   :  { %697 = vrot.lane.b32.xlu0 %v2498_v32, %s2681_s15 }
 0xa8f   :  { %v698_v33 = vpop.permute.xlu0 %697 }
 0xa90   :  { %v700_v34 = vmul.f32 %v2496_v26, %v698_v33 }
 0xa92   :  { %702 = vrot.lane.b32.xlu1 %v700_v34, %s2682_s4 }
 0xb04   :  { %v703_v35 = vpop.permute.xlu1 %702 }
 0xb05   :  { %705 = vst.msk [vmem:[#allocation4 + $0x6] sm:$0x3] %vm383_vm2, %v703_v35  ;;  %2336 = vmatmul.mubr.msk.f32.vlgmr.msra.gmra.mxu0 %vm280_vm3, %v703_v35 }
 0xb06   :  { %2350 = vmatpush3.msra.mxu0 %v2761_v4  ;;  %2357 = vmatprep.mubr.msk.f32.mxu0 %vm2680_vm1, %v2679_v5 }
 0xb07   :  { %2351 = vmatprep.subr.mxu0 %v2679_v5 }
 0xb08   :  { %2352 = vmatpush3.msra.mxu0 %v2768_v6 }
 0xb09   :  { %2353 = vmatprep.subr.mxu0 %v2679_v5 }
 0xb0a   :  { %2354 = vmatpush3.msra.mxu0 %v2777_v7 }
 0xb0b   :  { %2355 = vmatprep.subr.mxu0 %v2679_v5 }
 0xb0c   :  { %2356 = vmatpush3.msra.mxu0 %v2784_v8 }
 0xb0d   :  { %2371 = vmatprep.subr.mxu0 %v2679_v5 }
 0xbc5   :  { %v779_v37 = vpop.f32.mrf.mxu0 }
 0xbc6   :  { %v783_v38 = vadd.f32 %v779_v37, %v706_v36 }
 0xbc7   :  { %v2337_v39 = vpop.f32.mrf.mxu0 }
 0xbc8   :  { %2499 = vtanh.f32 %v783_v38  ;;  %v2156_v41 = vmul.f32 -1.442695, %v783_v38 }
 0xbca   :  { %2501 = vpow2.f32 %v2156_v41  ;;  %v2928_v41 = vld [vmem:[#allocation11 + $0x18] sm:$0xff] }
 0xbd5   :  { %v2500_v40 = vpop.eup %2499 }
 0xbd6   :  { %793 = vrot.lane.b32.xlu0 %v2500_v40, %s2681_s15 }
 0xbd7   :  { %v2502_v42 = vpop.eup %2501 }
 0xbd8   :  { %v787_v43 = vadd.f32 1.0, %v2502_v42  ;;  %v2930_v42 = vld [vmem:[#allocation11 + $0x10] sm:$0xff] }
 0xbda   :  { %2503 = vrcp.f32 %v787_v43  ;;  %v2935_v43 = vld [vmem:[#allocation11 + $0x8] sm:$0xff] }
 0xbe7   :  { %v2504_v44 = vpop.eup %2503 }
 0xbe8   :  { %v791_v47 = vmul.f32 %v2504_v44, %v694_v31 }
 0xc48   :  { %v794_v45 = vpop.permute.xlu0 %793 }
 0xc49   :  { %v796_v46 = vmul.f32 %v2504_v44, %v794_v45 }
 0xc4b   :  { %798 = vrot.lane.b32.xlu1 %v796_v46, %s2682_s4 }
 0xcbd   :  { %v799_v48 = vpop.permute.xlu1 %798 }
 0xcbe   :  { %v801_v49 = vadd.f32 %v799_v48, %v791_v47 }
 0xcc0   :  { %2505 = vtanh.f32 %v801_v49 }
 0xccd   :  { %v2506_v50 = vpop.eup %2505 }
 0xcce   :  { %804 = vrot.lane.b32.xlu0 %v2506_v50, %s2681_s15 }
 0xd40   :  { %v805_v51 = vpop.permute.xlu0 %804 }
 0xd41   :  { %v807_v52 = vmul.f32 %v2504_v44, %v805_v51  ;;  %v2941_v44 = vld [vmem:[#allocation11] sm:$0xff] }
 0xd43   :  { %809 = vrot.lane.b32.xlu1 %v807_v52, %s2682_s4 }
 0xdb5   :  { %v810_v53 = vpop.permute.xlu1 %809 }
 0xdb6   :  { %812 = vst.msk [vmem:[#allocation4 + $0x8] sm:$0x3] %vm383_vm2, %v810_v53  ;;  %2347 = vmatmul.mubr.msk.f32.vlgmr.msra.gmra.mxu1 %vm280_vm3, %v810_v53 }
 0xdb7   :  { %2361 = vmatpush3.msra.mxu1 %v2761_v4  ;;  %2368 = vmatprep.mubr.msk.f32.mxu1 %vm2680_vm1, %v2679_v5 }
 0xdb8   :  { %2362 = vmatprep.subr.mxu1 %v2679_v5 }
 0xdb9   :  { %2363 = vmatpush3.msra.mxu1 %v2768_v6 }
 0xdba   :  { %2364 = vmatprep.subr.mxu1 %v2679_v5 }
 0xdbb   :  { %2365 = vmatpush3.msra.mxu1 %v2777_v7 }
 0xdbc   :  { %2366 = vmatprep.subr.mxu1 %v2679_v5 }
 0xdbd   :  { %2367 = vmatpush3.msra.mxu1 %v2784_v8 }
 0xdbe   :  { %2382 = vmatprep.subr.mxu1 %v2679_v5 }
 0xe76   :  { %v886_v55 = vpop.f32.mrf.mxu1 }
 0xe77   :  { %v890_v4 = vadd.f32 %v886_v55, %v813_v54 }
 0xe78   :  { %v2348_v56 = vpop.f32.mrf.mxu1 }
 0xe79   :  { %2507 = vtanh.f32 %v890_v4  ;;  %v2158_v58 = vmul.f32 -1.442695, %v890_v4 }
 0xe7b   :  { %2509 = vpow2.f32 %v2158_v58 }
 0xe86   :  { %v2508_v57 = vpop.eup %2507 }
 0xe87   :  { %900 = vrot.lane.b32.xlu0 %v2508_v57, %s2681_s15 }
 0xe88   :  { %v2510_v6 = vpop.eup %2509 }
 0xe89   :  { %v894_v59 = vadd.f32 1.0, %v2510_v6 }
 0xe8b   :  { %2511 = vrcp.f32 %v894_v59 }
 0xe98   :  { %v2512_v7 = vpop.eup %2511 }
 0xe99   :  { %v898_v8 = vmul.f32 %v2512_v7, %v801_v49  ;;  %v1134_v49 = vld [vmem:[#allocation3] sm:$0x3] }
 0xef9   :  { %v901_v60 = vpop.permute.xlu0 %900 }
 0xefa   :  { %v903_v61 = vmul.f32 %v2512_v7, %v901_v60 }
 0xefc   :  { %905 = vrot.lane.b32.xlu1 %v903_v61, %s2682_s4 }
 0xf6e   :  { %v906_v62 = vpop.permute.xlu1 %905 }
 0xf6f   :  { %v908_v63 = vadd.f32 %v906_v62, %v898_v8 }
 0xf71   :  { %2513 = vtanh.f32 %v908_v63 }
 0xf7e   :  { %v2514_v0 = vpop.eup %2513 }
 0xf7f   :  { %911 = vrot.lane.b32.xlu0 %v2514_v0, %s2681_s15 }
 0xff1   :  { %v912_v1 = vpop.permute.xlu0 %911 }
 0xff2   :  { %v914_v2 = vmul.f32 %v2512_v7, %v912_v1 }
 0xff4   :  { %916 = vrot.lane.b32.xlu1 %v914_v2, %s2682_s4 }
0x1066   :  { %v917_v3 = vpop.permute.xlu1 %916 }
0x1067   :  { %919 = vst.msk [vmem:[#allocation4 + $0xa] sm:$0x3] %vm383_vm2, %v917_v3  ;;  %2358 = vmatmul.mubr.msk.f32.vlgmr.msra.gmra.mxu0 %vm280_vm3, %v917_v3 }
0x1068   :  { %2379 = vmatprep.mubr.msk.f32.mxu0 %vm2680_vm1, %v2679_v5  ;;  %2372 = vmatpush3.msra.mxu0 %v2928_v41 }
0x1069   :  { %2373 = vmatprep.subr.mxu0 %v2679_v5 }
0x106a   :  { %2374 = vmatpush3.msra.mxu0 %v2930_v42 }
0x106b   :  { %2375 = vmatprep.subr.mxu0 %v2679_v5 }
0x106c   :  { %2376 = vmatpush3.msra.mxu0 %v2935_v43 }
0x106d   :  { %2377 = vmatprep.subr.mxu0 %v2679_v5 }
0x106e   :  { %2378 = vmatpush3.msra.mxu0 %v2941_v44 }
0x106f   :  { %2393 = vmatprep.subr.mxu0 %v2679_v5 }
0x1127   :  { %v993_v10 = vpop.f32.mrf.mxu0 }
0x1128   :  { %v997_v11 = vadd.f32 %v993_v10, %v920_v9 }
0x1129   :  { %v2359_v12 = vpop.f32.mrf.mxu0 }
0x112a   :  { %2515 = vtanh.f32 %v997_v11  ;;  %v2160_v14 = vmul.f32 -1.442695, %v997_v11 }
0x112c   :  { %2517 = vpow2.f32 %v2160_v14 }
0x1137   :  { %v2516_v13 = vpop.eup %2515 }
0x1138   :  { %1007 = vrot.lane.b32.xlu0 %v2516_v13, %s2681_s15 }
0x1139   :  { %v2518_v15 = vpop.eup %2517 }
0x113a   :  { %v1001_v16 = vadd.f32 1.0, %v2518_v15 }
0x113c   :  { %2519 = vrcp.f32 %v1001_v16 }
0x1149   :  { %v2520_v17 = vpop.eup %2519 }
0x114a   :  { %v1005_v20 = vmul.f32 %v2520_v17, %v908_v63  ;;  %v1241_v63 = vld [vmem:[#allocation3 + $0x2] sm:$0x3] }
0x11aa   :  { %v1008_v18 = vpop.permute.xlu0 %1007 }
0x11ab   :  { %v1010_v19 = vmul.f32 %v2520_v17, %v1008_v18 }
0x11ad   :  { %1012 = vrot.lane.b32.xlu1 %v1010_v19, %s2682_s4 }
0x121f   :  { %v1013_v21 = vpop.permute.xlu1 %1012 }
0x1220   :  { %v1015_v22 = vadd.f32 %v1013_v21, %v1005_v20 }
0x1222   :  { %2521 = vtanh.f32 %v1015_v22 }
0x122f   :  { %v2522_v23 = vpop.eup %2521 }
0x1230   :  { %1018 = vrot.lane.b32.xlu0 %v2522_v23, %s2681_s15 }
0x12a2   :  { %v1019_v24 = vpop.permute.xlu0 %1018 }
0x12a3   :  { %v1021_v25 = vmul.f32 %v2520_v17, %v1019_v24 }
0x12a5   :  { %1023 = vrot.lane.b32.xlu1 %v1021_v25, %s2682_s4 }
0x1317   :  { %v1024_v26 = vpop.permute.xlu1 %1023 }
0x1318   :  { %1026 = vst.msk [vmem:[#allocation4 + $0xc] sm:$0x3] %vm383_vm2, %v1024_v26  ;;  %2369 = vmatmul.mubr.msk.f32.vlgmr.msra.gmra.mxu1 %vm280_vm3, %v1024_v26 }
0x1319   :  { %2390 = vmatprep.mubr.msk.f32.mxu1 %vm2680_vm1, %v2679_v5  ;;  %2383 = vmatpush3.msra.mxu1 %v2928_v41 }
0x131a   :  { %2384 = vmatprep.subr.mxu1 %v2679_v5 }
0x131b   :  { %2385 = vmatpush3.msra.mxu1 %v2930_v42 }
0x131c   :  { %2386 = vmatprep.subr.mxu1 %v2679_v5 }
0x131d   :  { %2387 = vmatpush3.msra.mxu1 %v2935_v43 }
0x131e   :  { %2388 = vmatprep.subr.mxu1 %v2679_v5 }
0x131f   :  { %2389 = vmatpush3.msra.mxu1 %v2941_v44 }
0x1320   :  { %2404 = vmatprep.subr.mxu1 %v2679_v5 }
0x13d8   :  { %v1100_v28 = vpop.f32.mrf.mxu1 }
0x13d9   :  { %v1104_v29 = vadd.f32 %v1100_v28, %v1027_v27 }
0x13da   :  { %v2370_v30 = vpop.f32.mrf.mxu1 }
0x13db   :  { %2523 = vtanh.f32 %v1104_v29  ;;  %v2162_v32 = vmul.f32 -1.442695, %v1104_v29 }
0x13dd   :  { %2525 = vpow2.f32 %v2162_v32 }
0x13e8   :  { %v2524_v31 = vpop.eup %2523 }
0x13e9   :  { %1114 = vrot.lane.b32.xlu0 %v2524_v31, %s2681_s15 }
0x13ea   :  { %v2526_v33 = vpop.eup %2525 }
0x13eb   :  { %v1108_v34 = vadd.f32 1.0, %v2526_v33 }
0x13ed   :  { %2527 = vrcp.f32 %v1108_v34 }
0x13fa   :  { %v2528_v35 = vpop.eup %2527 }
0x13fb   :  { %v1112_v38 = vmul.f32 %v2528_v35, %v1015_v22  ;;  %v1348_v22 = vld [vmem:[#allocation3 + $0x4] sm:$0x3] }
0x145b   :  { %v1115_v36 = vpop.permute.xlu0 %1114 }
0x145c   :  { %v1117_v37 = vmul.f32 %v2528_v35, %v1115_v36 }
0x145e   :  { %1119 = vrot.lane.b32.xlu1 %v1117_v37, %s2682_s4 }
0x14d0   :  { %v1120_v39 = vpop.permute.xlu1 %1119 }
0x14d1   :  { %v1122_v40 = vadd.f32 %v1120_v39, %v1112_v38 }
0x14d3   :  { %2529 = vtanh.f32 %v1122_v40 }
0x14e0   :  { %v2530_v45 = vpop.eup %2529 }
0x14e1   :  { %1125 = vrot.lane.b32.xlu0 %v2530_v45, %s2681_s15 }
0x1553   :  { %v1126_v46 = vpop.permute.xlu0 %1125 }
0x1554   :  { %v1128_v47 = vmul.f32 %v2528_v35, %v1126_v46 }
0x1556   :  { %1130 = vrot.lane.b32.xlu1 %v1128_v47, %s2682_s4 }
0x15c8   :  { %v1131_v48 = vpop.permute.xlu1 %1130 }
0x15c9   :  { %1133 = vst.msk [vmem:[#allocation4 + $0xe] sm:$0x3] %vm383_vm2, %v1131_v48  ;;  %2380 = vmatmul.mubr.msk.f32.vlgmr.msra.gmra.mxu0 %vm280_vm3, %v1131_v48 }
0x15ca   :  { %2394 = vmatpush3.msra.mxu0 %v2928_v41  ;;  %2401 = vmatprep.mubr.msk.f32.mxu0 %vm2680_vm1, %v2679_v5 }
0x15cb   :  { %2395 = vmatprep.subr.mxu0 %v2679_v5 }
0x15cc   :  { %2396 = vmatpush3.msra.mxu0 %v2930_v42 }
0x15cd   :  { %2397 = vmatprep.subr.mxu0 %v2679_v5 }
0x15ce   :  { %2398 = vmatpush3.msra.mxu0 %v2935_v43 }
0x15cf   :  { %2399 = vmatprep.subr.mxu0 %v2679_v5 }
0x15d0   :  { %2400 = vmatpush3.msra.mxu0 %v2941_v44 }
0x15d1   :  { %2415 = vmatprep.subr.mxu0 %v2679_v5 }
0x1689   :  { %v1207_v50 = vpop.f32.mrf.mxu0 }
0x168a   :  { %v1211_v51 = vadd.f32 %v1207_v50, %v1134_v49 }
0x168b   :  { %v2381_v52 = vpop.f32.mrf.mxu0 }
0x168c   :  { %2531 = vtanh.f32 %v1211_v51  ;;  %v2164_v54 = vmul.f32 -1.442695, %v1211_v51 }
0x168e   :  { %2533 = vpow2.f32 %v2164_v54 }
0x1699   :  { %v2532_v53 = vpop.eup %2531 }
0x169a   :  { %1221 = vrot.lane.b32.xlu0 %v2532_v53, %s2681_s15 }
0x169b   :  { %v2534_v55 = vpop.eup %2533 }
0x169c   :  { %v1215_v4 = vadd.f32 1.0, %v2534_v55 }
0x169e   :  { %2535 = vrcp.f32 %v1215_v4 }
0x16ab   :  { %v2536_v56 = vpop.eup %2535 }
0x16ac   :  { %v1219_v6 = vmul.f32 %v2536_v56, %v1122_v40  ;;  %v1455_v40 = vld [vmem:[#allocation3 + $0x6] sm:$0x3] }
0x170c   :  { %v1222_v57 = vpop.permute.xlu0 %1221 }
0x170d   :  { %v1224_v58 = vmul.f32 %v2536_v56, %v1222_v57  ;;  %v1776_v57 = vld [vmem:[#allocation4] ss:$2 sm:$0xff] }
0x170f   :  { %1226 = vrot.lane.b32.xlu1 %v1224_v58, %s2682_s4  ;;  %v1562_v58 = vld [vmem:[#allocation3 + $0x8] sm:$0x3] }
0x1781   :  { %v1227_v59 = vpop.permute.xlu1 %1226 }
0x1782   :  { %v1229_v7 = vadd.f32 %v1227_v59, %v1219_v6 }
0x1784   :  { %2537 = vtanh.f32 %v1229_v7 }
0x1791   :  { %v2538_v60 = vpop.eup %2537 }
0x1792   :  { %1232 = vrot.lane.b32.xlu0 %v2538_v60, %s2681_s15 }
0x1804   :  { %v1233_v61 = vpop.permute.xlu0 %1232 }
0x1805   :  { %v1235_v8 = vmul.f32 %v2536_v56, %v1233_v61 }
0x1807   :  { %1237 = vrot.lane.b32.xlu1 %v1235_v8, %s2682_s4 }
0x1879   :  { %v1238_v62 = vpop.permute.xlu1 %1237 }
0x187a   :  { %1240 = vst.msk [vmem:[#allocation5] sm:$0x3] %vm383_vm2, %v1238_v62  ;;  %2391 = vmatmul.mubr.msk.f32.vlgmr.msra.gmra.mxu1 %vm280_vm3, %v1238_v62 }
0x187b   :  { %2405 = vmatpush3.msra.mxu1 %v2928_v41  ;;  %2412 = vmatprep.mubr.msk.f32.mxu1 %vm2680_vm1, %v2679_v5 }
0x187c   :  { %2406 = vmatprep.subr.mxu1 %v2679_v5 }
0x187d   :  { %2407 = vmatpush3.msra.mxu1 %v2930_v42 }
0x187e   :  { %2408 = vmatprep.subr.mxu1 %v2679_v5 }
0x187f   :  { %2409 = vmatpush3.msra.mxu1 %v2935_v43 }
0x1880   :  { %2410 = vmatprep.subr.mxu1 %v2679_v5 }
0x1881   :  { %2411 = vmatpush3.msra.mxu1 %v2941_v44 }
0x1882   :  { %2426 = vmatprep.subr.mxu1 %v2679_v5 }
0x193a   :  { %v1314_v0 = vpop.f32.mrf.mxu1 }
0x193b   :  { %v1318_v1 = vadd.f32 %v1314_v0, %v1241_v63 }
0x193c   :  { %v2392_v2 = vpop.f32.mrf.mxu1 }
0x193d   :  { %2539 = vtanh.f32 %v1318_v1  ;;  %v2166_v9 = vmul.f32 -1.442695, %v1318_v1 }
0x193f   :  { %2541 = vpow2.f32 %v2166_v9 }
0x194a   :  { %v2540_v3 = vpop.eup %2539 }
0x194b   :  { %1328 = vrot.lane.b32.xlu0 %v2540_v3, %s2681_s15 }
0x194c   :  { %v2542_v10 = vpop.eup %2541 }
0x194d   :  { %v1322_v11 = vadd.f32 1.0, %v2542_v10 }
0x194f   :  { %2543 = vrcp.f32 %v1322_v11 }
0x195c   :  { %v2544_v12 = vpop.eup %2543 }
0x195d   :  { %v1326_v15 = vmul.f32 %v2544_v12, %v1229_v7 }
0x19bd   :  { %v1329_v13 = vpop.permute.xlu0 %1328 }
0x19be   :  { %v1331_v14 = vmul.f32 %v2544_v12, %v1329_v13 }
0x19c0   :  { %1333 = vrot.lane.b32.xlu1 %v1331_v14, %s2682_s4  ;;  %v1669_v14 = vld [vmem:[#allocation3 + $0xa] sm:$0x3] }
0x1a32   :  { %v1334_v16 = vpop.permute.xlu1 %1333 }
0x1a33   :  { %v1336_v17 = vadd.f32 %v1334_v16, %v1326_v15 }
0x1a35   :  { %2545 = vtanh.f32 %v1336_v17 }
0x1a42   :  { %v2546_v18 = vpop.eup %2545 }
0x1a43   :  { %1339 = vrot.lane.b32.xlu0 %v2546_v18, %s2681_s15 }
0x1ab5   :  { %v1340_v19 = vpop.permute.xlu0 %1339 }
0x1ab6   :  { %v1342_v20 = vmul.f32 %v2544_v12, %v1340_v19 }
0x1ab8   :  { %1344 = vrot.lane.b32.xlu1 %v1342_v20, %s2682_s4 }
0x1b2a   :  { %v1345_v21 = vpop.permute.xlu1 %1344 }
0x1b2b   :  { %1347 = vst.msk [vmem:[#allocation5 + $0x2] sm:$0x3] %vm383_vm2, %v1345_v21  ;;  %2402 = vmatmul.mubr.msk.f32.vlgmr.msra.gmra.mxu0 %vm280_vm3, %v1345_v21 }
0x1b2c   :  { %2416 = vmatpush3.msra.mxu0 %v2928_v41  ;;  %2423 = vmatprep.mubr.msk.f32.mxu0 %vm2680_vm1, %v2679_v5 }
0x1b2d   :  { %2417 = vmatprep.subr.mxu0 %v2679_v5 }
0x1b2e   :  { %2418 = vmatpush3.msra.mxu0 %v2930_v42 }
0x1b2f   :  { %2419 = vmatprep.subr.mxu0 %v2679_v5 }
0x1b30   :  { %2420 = vmatpush3.msra.mxu0 %v2935_v43 }
0x1b31   :  { %2421 = vmatprep.subr.mxu0 %v2679_v5 }
0x1b32   :  { %2422 = vmatpush3.msra.mxu0 %v2941_v44 }
0x1b33   :  { %2437 = vmatprep.subr.mxu0 %v2679_v5 }
0x1beb   :  { %v1421_v23 = vpop.f32.mrf.mxu0 }
0x1bec   :  { %v1425_v24 = vadd.f32 %v1421_v23, %v1348_v22 }
0x1bed   :  { %v2403_v25 = vpop.f32.mrf.mxu0 }
0x1bee   :  { %2547 = vtanh.f32 %v1425_v24  ;;  %v2168_v27 = vmul.f32 -1.442695, %v1425_v24 }
0x1bf0   :  { %2549 = vpow2.f32 %v2168_v27 }
0x1bfb   :  { %v2548_v26 = vpop.eup %2547 }
0x1bfc   :  { %1435 = vrot.lane.b32.xlu0 %v2548_v26, %s2681_s15 }
0x1bfd   :  { %v2550_v28 = vpop.eup %2549 }
0x1bfe   :  { %v1429_v29 = vadd.f32 1.0, %v2550_v28 }
0x1c00   :  { %2551 = vrcp.f32 %v1429_v29 }
0x1c0d   :  { %v2552_v30 = vpop.eup %2551 }
0x1c0e   :  { %v1433_v33 = vmul.f32 %v2552_v30, %v1336_v17 }
0x1c6e   :  { %v1436_v31 = vpop.permute.xlu0 %1435 }
0x1c6f   :  { %v1438_v32 = vmul.f32 %v2552_v30, %v1436_v31 }
0x1c71   :  { %1440 = vrot.lane.b32.xlu1 %v1438_v32, %s2682_s4 }
0x1ce3   :  { %v1441_v34 = vpop.permute.xlu1 %1440 }
0x1ce4   :  { %v1443_v35 = vadd.f32 %v1441_v34, %v1433_v33  ;;  %v1954_v33 = vld [vmem:[#allocation4 + $0x1] ss:$2 sm:$0xff] }
0x1ce6   :  { %2553 = vtanh.f32 %v1443_v35 }
0x1cf3   :  { %v2554_v36 = vpop.eup %2553 }
0x1cf4   :  { %1446 = vrot.lane.b32.xlu0 %v2554_v36, %s2681_s15 }
0x1d66   :  { %v1447_v37 = vpop.permute.xlu0 %1446 }
0x1d67   :  { %v1449_v38 = vmul.f32 %v2552_v30, %v1447_v37 }
0x1d69   :  { %1451 = vrot.lane.b32.xlu1 %v1449_v38, %s2682_s4 }
0x1ddb   :  { %v1452_v39 = vpop.permute.xlu1 %1451 }
0x1ddc   :  { %1454 = vst.msk [vmem:[#allocation5 + $0x4] sm:$0x3] %vm383_vm2, %v1452_v39  ;;  %2413 = vmatmul.mubr.msk.f32.vlgmr.msra.gmra.mxu1 %vm280_vm3, %v1452_v39 }
0x1ddd   :  { %2427 = vmatpush3.msra.mxu1 %v2928_v41  ;;  %2434 = vmatprep.mubr.msk.f32.mxu1 %vm2680_vm1, %v2679_v5 }
0x1dde   :  { %2428 = vmatprep.subr.mxu1 %v2679_v5 }
0x1ddf   :  { %2429 = vmatpush3.msra.mxu1 %v2930_v42 }
0x1de0   :  { %2430 = vmatprep.subr.mxu1 %v2679_v5 }
0x1de1   :  { %2431 = vmatpush3.msra.mxu1 %v2935_v43 }
0x1de2   :  { %2432 = vmatprep.subr.mxu1 %v2679_v5 }
0x1de3   :  { %2433 = vmatpush3.msra.mxu1 %v2941_v44 }
0x1de4   :  { %2442 = vmatprep.subr.mxu1 %v2679_v5 }
0x1e9c   :  { %v1528_v45 = vpop.f32.mrf.mxu1 }
0x1e9d   :  { %v1532_v41 = vadd.f32 %v1528_v45, %v1455_v40 }
0x1e9e   :  { %v2414_v46 = vpop.f32.mrf.mxu1 }
0x1e9f   :  { %2555 = vtanh.f32 %v1532_v41  ;;  %v2170_v48 = vmul.f32 -1.442695, %v1532_v41 }
0x1ea1   :  { %2557 = vpow2.f32 %v2170_v48 }
0x1eac   :  { %v2556_v47 = vpop.eup %2555 }
0x1ead   :  { %1542 = vrot.lane.b32.xlu0 %v2556_v47, %s2681_s15 }
0x1eae   :  { %v2558_v42 = vpop.eup %2557 }
0x1eaf   :  { %v1536_v49 = vadd.f32 1.0, %v2558_v42 }
0x1eb1   :  { %2559 = vrcp.f32 %v1536_v49 }
0x1ebe   :  { %v2560_v43 = vpop.eup %2559 }
0x1ebf   :  { %v1540_v44 = vmul.f32 %v2560_v43, %v1443_v35 }
0x1f1f   :  { %v1543_v50 = vpop.permute.xlu0 %1542 }
0x1f20   :  { %v1545_v51 = vmul.f32 %v2560_v43, %v1543_v50 }
0x1f22   :  { %1547 = vrot.lane.b32.xlu1 %v1545_v51, %s2682_s4 }
0x1f94   :  { %v1548_v52 = vpop.permute.xlu1 %1547 }
0x1f95   :  { %v1550_v53 = vadd.f32 %v1548_v52, %v1540_v44 }
0x1f97   :  { %2561 = vtanh.f32 %v1550_v53 }
0x1fa4   :  { %v2562_v54 = vpop.eup %2561 }
0x1fa5   :  { %1553 = vrot.lane.b32.xlu0 %v2562_v54, %s2681_s15 }
0x2017   :  { %v1554_v55 = vpop.permute.xlu0 %1553 }
0x2018   :  { %v1556_v4 = vmul.f32 %v2560_v43, %v1554_v55 }
0x201a   :  { %1558 = vrot.lane.b32.xlu1 %v1556_v4, %s2682_s4 }
0x208c   :  { %v1559_v56 = vpop.permute.xlu1 %1558 }
0x208d   :  { %1561 = vst.msk [vmem:[#allocation5 + $0x6] sm:$0x3] %vm383_vm2, %v1559_v56  ;;  %2424 = vmatmul.mubr.msk.f32.vlgmr.msra.gmra.mxu0 %vm280_vm3, %v1559_v56 }
0x208e   :  { %2438 = vmatpush3.xpose.msk.msra.mxu0 %vm280_vm3, %v1776_v57  ;;  %2439 = vmatprep.mubr.msk.f32.mxu0 %vm2680_vm1, %v2679_v5 }
0x208f   :  { %2447 = vmatprep.subr.mxu0 %v2679_v5 }
0x214d   :  { %v1635_v6 = vpop.f32.mrf.mxu0 }
0x214e   :  { %v1639_v59 = vadd.f32 %v1635_v6, %v1562_v58 }
0x214f   :  { %v2425_v7 = vpop.f32.mrf.mxu0 }
0x2150   :  { %2563 = vtanh.f32 %v1639_v59  ;;  %v2172_v61 = vmul.f32 -1.442695, %v1639_v59 }
0x2152   :  { %2565 = vpow2.f32 %v2172_v61 }
0x215d   :  { %v2564_v60 = vpop.eup %2563 }
0x215e   :  { %1649 = vrot.lane.b32.xlu0 %v2564_v60, %s2681_s15 }
0x215f   :  { %v2566_v8 = vpop.eup %2565 }
0x2160   :  { %v1643_v62 = vadd.f32 1.0, %v2566_v8 }
0x2162   :  { %2567 = vrcp.f32 %v1643_v62 }
0x216f   :  { %v2568_v63 = vpop.eup %2567 }
0x2170   :  { %v1647_v2 = vmul.f32 %v2568_v63, %v1550_v53 }
0x21d0   :  { %v1650_v0 = vpop.permute.xlu0 %1649 }
0x21d1   :  { %v1652_v1 = vmul.f32 %v2568_v63, %v1650_v0 }
0x21d3   :  { %1654 = vrot.lane.b32.xlu1 %v1652_v1, %s2682_s4 }
0x2245   :  { %v1655_v3 = vpop.permute.xlu1 %1654 }
0x2246   :  { %v1657_v9 = vadd.f32 %v1655_v3, %v1647_v2 }
0x2248   :  { %2569 = vtanh.f32 %v1657_v9 }
0x2255   :  { %v2570_v10 = vpop.eup %2569 }
0x2256   :  { %1660 = vrot.lane.b32.xlu0 %v2570_v10, %s2681_s15 }
0x22c8   :  { %v1661_v11 = vpop.permute.xlu0 %1660 }
0x22c9   :  { %v1663_v12 = vmul.f32 %v2568_v63, %v1661_v11 }
0x22cb   :  { %1665 = vrot.lane.b32.xlu1 %v1663_v12, %s2682_s4 }
0x233d   :  { %v1666_v13 = vpop.permute.xlu1 %1665 }
0x233e   :  { %1668 = vst.msk [vmem:[#allocation5 + $0x8] sm:$0x3] %vm383_vm2, %v1666_v13  ;;  %2435 = vmatmul.mubr.msk.f32.vlgmr.msra.gmra.mxu1 %vm280_vm3, %v1666_v13 }
0x233f   :  { %2443 = vmatpush3.msra.mxu1 %v1776_v57  ;;  %2444 = vmatprep.mubr.msk.f32.mxu1 %vm2680_vm1, %v2679_v5 }
0x2340   :  { %2452 = vmatprep.subr.mxu1 %v2679_v5 }
0x23fe   :  { %v1742_v15 = vpop.f32.mrf.mxu1 }
0x23ff   :  { %v1746_v16 = vadd.f32 %v1742_v15, %v1669_v14 }
0x2400   :  { %v2436_v17 = vpop.f32.mrf.mxu1 }
0x2401   :  { %2571 = vtanh.f32 %v1746_v16  ;;  %v2174_v19 = vmul.f32 -1.442695, %v1746_v16 }
0x2403   :  { %2573 = vpow2.f32 %v2174_v19 }
0x240e   :  { %v2572_v18 = vpop.eup %2571 }
0x240f   :  { %1756 = vrot.lane.b32.xlu0 %v2572_v18, %s2681_s15 }
0x2410   :  { %v2574_v20 = vpop.eup %2573 }
0x2411   :  { %v1750_v21 = vadd.f32 1.0, %v2574_v20 }
0x2413   :  { %2575 = vrcp.f32 %v1750_v21 }
0x2420   :  { %v2576_v22 = vpop.eup %2575 }
0x2421   :  { %v1754_v25 = vmul.f32 %v2576_v22, %v1657_v9 }
0x2481   :  { %v1757_v23 = vpop.permute.xlu0 %1756 }
0x2482   :  { %v1759_v24 = vmul.f32 %v2576_v22, %v1757_v23 }
0x2484   :  { %1761 = vrot.lane.b32.xlu1 %v1759_v24, %s2682_s4 }
0x24f6   :  { %v1762_v26 = vpop.permute.xlu1 %1761 }
0x24f7   :  { %v1764_v27 = vadd.f32 %v1762_v26, %v1754_v25 }
0x24f9   :  { %2577 = vtanh.f32 %v1764_v27 }
0x2506   :  { %v2578_v28 = vpop.eup %2577 }
0x2507   :  { %1767 = vrot.lane.b32.xlu0 %v2578_v28, %s2681_s15 }
0x2579   :  { %v1768_v29 = vpop.permute.xlu0 %1767 }
0x257a   :  { %v1770_v30 = vmul.f32 %v2576_v22, %v1768_v29 }
0x257c   :  { %1772 = vrot.lane.b32.xlu1 %v1770_v30, %s2682_s4 }
0x25ee   :  { %v1773_v31 = vpop.permute.xlu1 %1772 }
0x25ef   :  { %1775 = vst.msk [vmem:[#allocation5 + $0xa] sm:$0x3] %vm383_vm2, %v1773_v31 }
0x25f6   :  { %v1777_v32 = vld [vmem:[#allocation5] ss:$2 sm:$0x3f]  ;;  %v1956_v34 = vld [vmem:[#allocation5 + $0x1] ss:$2 sm:$0x3f] }
0x25f7   :  { %2440 = vmatmul.mubr.msk.f32.vlgmr.msra.gmra.mxu0 %vm280_vm3, %v1777_v32 }
0x25f8   :  { %2448 = vmatpush3.xpose.msk.msra.mxu0 %vm280_vm3, %v1954_v33  ;;  %2449 = vmatprep.mubr.msk.f32.mxu0 %vm2680_vm1, %v2679_v5 }
0x25fb   :  { %2450 = vmatmul.mubr.msk.f32.vlgmr.msra.gmra.mxu0 %vm280_vm3, %v1956_v34 }
0x26b7   :  { %v1850_v35 = vpop.f32.mrf.mxu0 }
0x26b8   :  { %v1855_v36 = vsel %vm1854_vm4, %v1850_v35, -inf }
0x26b9   :  { %1856 = vmax.xlane.f32.xlu0 %v1855_v36  ;;  %v2441_v37 = vpop.f32.mrf.mxu0 }
0x26bb   :  { %v2029_v38 = vpop.f32.mrf.mxu0 }
0x26bc   :  { %v2033_v39 = vsel %vm1854_vm4, %v2029_v38, -inf }
0x26bd   :  { %2034 = vmax.xlane.f32.xlu1 %v2033_v39  ;;  %v2451_v40 = vpop.f32.mrf.mxu0 }
0x2742   :  { %v1857_v45 = vpop.xlane.xlu0 %1856 }
0x2743   :  { %v1858_v41 = vsub.f32 %v1850_v35, %v1857_v45 }
0x2745   :  { %v1859_v46 = vmul.f32 1.442695, %v1858_v41 }
0x2746   :  { %v2035_v47 = vpop.xlane.xlu1 %2034 }
0x2747   :  { %2579 = vpow2.f32 %v1859_v46  ;;  %v2036_v48 = vsub.f32 %v2029_v38, %v2035_v47 }
0x2749   :  { %v2037_v42 = vmul.f32 1.442695, %v2036_v48 }
0x274b   :  { %2581 = vpow2.f32 %v2037_v42 }
0x2754   :  { %v2580_v49 = vpop.eup %2579 }
0x2755   :  { %v1861_v43 = vsel %vm1854_vm4, %v2580_v49, 0.0 }
0x2756   :  { %1862 = vadd.xlane.f32.xlu0 %v1861_v43 }
0x2758   :  { %v2582_v50 = vpop.eup %2581 }
0x2759   :  { %v2039_v51 = vsel %vm1854_vm4, %v2582_v50, 0.0 }
0x275a   :  { %2040 = vadd.xlane.f32.xlu0 %v2039_v51 }
0x27df   :  { %v1863_v44 = vpop.xlane.xlu0 %1862 }
0x27e0   :  { %2583 = vrcp.f32 %v1863_v44 }
0x27e3   :  { %v2041_v52 = vpop.xlane.xlu0 %2040 }
0x27e4   :  { %2585 = vrcp.f32 %v2041_v52 }
0x27ed   :  { %v2584_v53 = vpop.eup %2583 }
0x27ee   :  { %v1865_v54 = vmul.f32 %v2584_v53, %v1863_v44 }
0x27f0   :  { %v1866_v55 = vsub.f32 2.0, %v1865_v54 }
0x27f1   :  { %v2586_v4 = vpop.eup %2585 }
0x27f2   :  { %v1867_v56 = vmul.f32 %v2584_v53, %v1866_v55  ;;  %v2043_v57 = vmul.f32 %v2586_v4, %v2041_v52 }
0x27f4   :  { %v1868_v58 = vmul.f32 %v2580_v49, %v1867_v56  ;;  %v2044_v6 = vsub.f32 2.0, %v2043_v57 }
0x27f6   :  { %v2045_v59 = vmul.f32 %v2586_v4, %v2044_v6  ;;  %2445 = vmatmul.mubr.msk.f32.vlgmr.msra.gmra.mxu1 %vm1869_vm5, %v1868_v58  ;;  %v1951_v7 = vsel %vm1869_vm5, %v1868_v58, 0.0 }
0x27f7   :  { %1952 = vst [vmem:[%s3074_s9] sm:$0x3f] %v1951_v7  ;;  %2453 = vmatpush3.msra.mxu1 %v1954_v33  ;;  %2454 = vmatprep.mubr.msk.f32.mxu1 %vm2680_vm1, %v2679_v5 }
0x27f8   :  { %v2046_v60 = vmul.f32 %v2582_v50, %v2045_v59 }
0x27fa   :  { %v2128_v61 = vsel %vm1869_vm5, %v2046_v60, 0.0  ;;  %2455 = vmatmul.mubr.msk.f32.vlgmr.msra.gmra.mxu1 %vm1869_vm5, %v2046_v60 }
0x27fb   :  { %2182 = vst [vmem:[%s3074_s9 + $0x8] sm:$0x3f] %v2128_v61 }
0x28b6   :  { %v1939_v8 = vpop.f32.mrf.mxu1 }
0x28b7   :  { %1944 = vrot.lane.b32.xlu1 %v1939_v8, %s2682_s4 }
0x28b8   :  { %v2446_v62 = vpop.f32.mrf.mxu1 }
0x28ba   :  { %v2116_v63 = vpop.f32.mrf.mxu1 }
0x28bb   :  { %2121 = vrot.lane.b32.xlu0 %v2116_v63, %s2682_s4 }
0x28bc   :  { %v2456_v0 = vpop.f32.mrf.mxu1 }
0x2929   :  { %v1945_v1 = vpop.permute.xlu1 %1944 }
0x292a   :  { %v1947_v2 = vsel %vm280_vm3, %v1777_v32, %v1945_v1 }
0x292b   :  { %v1949_v5 = vsel %vm1948_vm6, %v1947_v2, 0.0 }
0x292c   :  { %1950 = vst [vmem:[%s3073_s8] sm:$0x3f] %v1949_v5 }
0x292d   :  { %v2122_v3 = vpop.permute.xlu0 %2121 }
0x292e   :  { %v2124_v9 = vsel %vm280_vm3, %v1956_v34, %v2122_v3 }
0x292f   :  { %v2125_v10 = vsel %vm1948_vm6, %v2124_v9, 0.0 }
0x2930   :  { %2181 = vst [vmem:[%s3073_s8 + $0x8] sm:$0x3f] %v2125_v10 }
0x2931   :  { %2139 = vsyncpa [#allocation7], 1 }
0x2932   :  { %2140 = vsyncpa [#allocation9], 1 }
0x2933   :  { %2141 = vsyncpa [#allocation12], 1 }

</bundles_post_ra>
